<compile_context>
chip_gen: v7x
topology: tpu7x:2x2x1
jax: 0.10.0
libtpu: 0.0.40
codegen_flags: <defaults>
</compile_context>

<pallas_src>
import functools

import jax
import jax.numpy as jnp
from jax.experimental import pallas as pl
from jax.experimental.pallas import tpu as pltpu

LANE = 128
BN_EPS = 1e-5


def _round_up(x, m):
    return (x + m - 1) // m * m


def _pad_channels(c):
    # Lane-pad only when the channel count exceeds one lane group; small channel counts
    # are cheaper unpadded (HBM traffic scales with the real C; last dim == full dim is legal).
    # TODO(synk): on v6e/v7x, pad 129..256 up to 256 to fill the 2x256^2 MXU.
    return c if c <= LANE else _round_up(c, LANE)


def _vmem_capacity_bytes():
    try:
        cap = int(pltpu.get_tpu_info().vmem_capacity_bytes)
        if cap > 0:
            return cap
    except Exception:
        pass
    return 64 * 1024 * 1024      # conservative fallback (v7x per-core VMEM)


def _vmem_limit_bytes(cap):
    # ~62% of per-core VMEM: 80 MiB on v5e/v6e (128 MiB parts), 40 MiB on v7x (64 MiB/TC).
    return int(min(cap * 5 // 8, 112 * 1024 * 1024))


def _pick_row_tile(H, per_row_bytes, fixed_bytes, budget_bytes, n_parallel=1,
                   max_rows_cap=256):
    avail = max(budget_bytes - fixed_bytes, per_row_bytes)
    max_rows = min(H, max_rows_cap, max(1, avail // per_row_bytes))
    # Keep at least ~4 grid steps so the DMA pipeline and both TensorCores (v7x megacore)
    # have work even for tiny batches.
    max_rows = int(min(max_rows, max(1, (H * n_parallel) // 4)))
    # TODO(synk): for H with no reasonable divisor (e.g. prime H), switch to a pl.cdiv grid
    # with in-kernel row masking instead of degrading toward tH=1.
    for t in range(max_rows, 0, -1):
        if H % t == 0:
            return t
    return 1


# ----------------------------------------------------------------------------
# Fused kernel: [optional BN+ReLU on the input load] -> folded 3x3 DS-conv as 9
# accumulating bf16 MXU matmuls -> bias -> bf16 output tile + per-tile BN partials.
# ----------------------------------------------------------------------------
def _fused_dsconv_kernel(x_mid_ref, x_top_ref, x_bot_ref, scale_ref, shift_ref,
                         w_ref, b_ref, o_ref, stats_ref, *,
                         apply_input_bnrelu, tH, W):
    j = pl.program_id(1)
    nH = pl.num_programs(1)
    cin = x_mid_ref.shape[-1]
    cout = o_ref.shape[-1]

    if apply_input_bnrelu:
        scale = scale_ref[0]
        shift = shift_ref[0]

    def load_act(v):
        v = v.astype(jnp.float32)
        if apply_input_bnrelu:
            v = jnp.maximum(v * scale + shift, 0.0)
        return v

    mid = load_act(x_mid_ref[0])       # (tH, W, Cin)  rows [j*tH, (j+1)*tH)
    top = load_act(x_top_ref[0, 0])    # (W, Cin)      row  j*tH - 1   (clamped)
    bot = load_act(x_bot_ref[0, 0])    # (W, Cin)      row (j+1)*tH    (clamped)
    # Zero the halo rows that fall outside the image (conv "padding=1").
    top = jnp.where(j > 0, top, 0.0)
    bot = jnp.where(j < nH - 1, bot, 0.0)

    rows = jnp.concatenate([top[None], mid, bot[None]], axis=0)   # (tH+2, W, Cin)
    zcol = jnp.zeros((tH + 2, 1, cin), jnp.float32)
    xw = jnp.concatenate([zcol, rows, zcol], axis=1)              # (tH+2, W+2, Cin)
    # TODO(synk): pad W to a multiple of 8 sublanes (with stats masking) so the kw-shifted
    # slices below never cross a vreg tile boundary for odd widths.

    # 3x3 conv as 9 accumulating MXU matmuls; bf16 operands, f32 accumulation.
    acc = None
    for kh in range(3):
        for kw in range(3):
            tap = xw[kh:kh + tH, kw:kw + W, :].reshape(tH * W, cin)
            d = jnp.dot(tap.astype(jnp.bfloat16), w_ref[kh * 3 + kw],
                        preferred_element_type=jnp.float32)
            acc = d if acc is None else acc + d
    y = acc + b_ref[0]                                            # fused dw+pw bias (f32)

    o_ref[0] = y.reshape(tH, W, cout).astype(o_ref.dtype)

    # Per-(image, row-tile) partial BN statistics of the pre-BN conv output (kept f32).
    stats_ref[0, 0] = jnp.concatenate(
        [jnp.sum(y, axis=0, keepdims=True),
         jnp.sum(y * y, axis=0, keepdims=True)], axis=0)


def fused_dsconv(x, w, b, scale, shift, *, apply_input_bnrelu,
                 out_dtype=jnp.bfloat16):
    """x: (N,H,W,Cin) NHWC. w: (9,Cin,Cout) bf16 fused tap weights. b/scale/shift: (1,C) f32.
    Returns (y, stats): y (N,H,W,Cout) pre-BN conv output (out_dtype) and
    stats (N, nH, 2, Cout) f32 per-row-tile (sum, sum-of-squares) partials."""
    N, H, W, Cin = x.shape
    Cout = w.shape[-1]

    cap = _vmem_capacity_bytes()
    vmem_limit = _vmem_limit_bytes(cap)
    x_bytes = jnp.dtype(x.dtype).itemsize
    per_row = W * (Cin * x_bytes * 2      # input row tile (double-buffered)
                   + Cout * 2 * 2         # bf16 output tile (double-buffered)
                   + Cin * (4 * 2 + 2)    # f32 halo-widened rows + bf16 tap copy
                   + Cout * 4 * 2)        # f32 accumulator / biased result
    # NOTE: constant-index operands (w, b, scale, shift) are still double-buffered by the
    # default pipeline; budget two copies of the fused weight.
    # TODO(synk): pipeline_mode=pl.Buffered(1) on the constant operands once that path is
    # fully plumbed through the pallas_call TPU pipeline, to reclaim one weight copy.
    fixed = 2 * 9 * Cin * Cout * 2 + 8 * (Cin + Cout) * 4 + (1 << 20)
    tH = _pick_row_tile(H, per_row, fixed, vmem_limit // 2, n_parallel=N)
    nH = H // tH

    kernel = functools.partial(_fused_dsconv_kernel,
                               apply_input_bnrelu=apply_input_bnrelu, tH=tH, W=W)
    y, stats = pl.pallas_call(
        kernel,
        out_shape=(jax.ShapeDtypeStruct((N, H, W, Cout), out_dtype),
                   jax.ShapeDtypeStruct((N, nH, 2, Cout), jnp.float32)),
        grid=(N, nH),
        in_specs=[
            # main row tile
            pl.BlockSpec((1, tH, W, Cin), lambda n, j: (n, j, 0, 0)),
            # one-row halo above / below (index clamped, masked in-kernel)
            pl.BlockSpec((1, 1, W, Cin),
                         lambda n, j: (n, jnp.maximum(j * tH - 1, 0), 0, 0)),
            pl.BlockSpec((1, 1, W, Cin),
                         lambda n, j: (n, jnp.minimum((j + 1) * tH, H - 1), 0, 0)),
            # previous layer's BN scale / shift (applied on input load)
            pl.BlockSpec((1, Cin), lambda n, j: (0, 0)),
            pl.BlockSpec((1, Cin), lambda n, j: (0, 0)),
            # fused per-tap (9, Cin, Cout) bf16 weight and (1, Cout) f32 bias
            pl.BlockSpec((9, Cin, Cout), lambda n, j: (0, 0, 0)),
            pl.BlockSpec((1, Cout), lambda n, j: (0, 0)),
        ],
        out_specs=[
            pl.BlockSpec((1, tH, W, Cout), lambda n, j: (n, j, 0, 0)),
            pl.BlockSpec((1, 1, 2, Cout), lambda n, j: (n, j, 0, 0)),
        ],
        compiler_params=pltpu.CompilerParams(
            dimension_semantics=("parallel", "parallel"),
            vmem_limit_bytes=vmem_limit),
    )(x, x, x, scale, shift, w, b)
    return y, stats


# ----------------------------------------------------------------------------
# Final BatchNorm affine + ReLU (elementwise, row-tiled); emits only real channels.
# ----------------------------------------------------------------------------
def _bn_relu_kernel(y_ref, scale_ref, shift_ref, o_ref):
    y = y_ref[0].astype(jnp.float32)
    out = jnp.maximum(y * scale_ref[0] + shift_ref[0], 0.0)
    c_out = o_ref.shape[-1]
    if c_out != y.shape[-1]:
        out = out[:, :, :c_out]       # drop lane padding inside the kernel
    o_ref[0] = out.astype(o_ref.dtype)


def bn_relu(y, scale, shift, c_out, out_dtype=jnp.float32):
    N, H, W, C = y.shape
    cap = _vmem_capacity_bytes()
    vmem_limit = _vmem_limit_bytes(cap)
    per_row = W * (C * jnp.dtype(y.dtype).itemsize * 2 + C * 4
                   + c_out * jnp.dtype(out_dtype).itemsize * 2)
    tH = _pick_row_tile(H, per_row, 1 << 20, vmem_limit // 2, n_parallel=N)
    # TODO(synk): also fold the NHWC->NCHW transpose into out_specs ((1, C, tH, W) blocks)
    # to remove the remaining wrapper-side transpose pass entirely.
    return pl.pallas_call(
        _bn_relu_kernel,
        out_shape=jax.ShapeDtypeStruct((N, H, W, c_out), out_dtype),
        grid=(N, H // tH),
        in_specs=[
            pl.BlockSpec((1, tH, W, C), lambda n, j: (n, j, 0, 0)),
            pl.BlockSpec((1, C), lambda n, j: (0, 0)),
            pl.BlockSpec((1, C), lambda n, j: (0, 0)),
        ],
        out_specs=pl.BlockSpec((1, tH, W, c_out), lambda n, j: (n, j, 0, 0)),
        compiler_params=pltpu.CompilerParams(
            dimension_semantics=("parallel", "parallel"),
            vmem_limit_bytes=vmem_limit),
    )(y, scale, shift)


# ----------------------------------------------------------------------------
# Host-side helpers: BN scale/shift from partial stats, weight folding / packing.
# ----------------------------------------------------------------------------
def _bn_scale_shift(stats, count, gamma, beta, eps=BN_EPS):
    # TODO(synk): E[x^2]-E[x]^2 can lose precision for very large N*H*W; switch to
    # per-tile centered (Welford-style) partials if that regime matters.
    s = jnp.sum(stats, axis=(0, 1))                        # (2, C) over batch & row tiles
    mean = s[0] / count
    var = jnp.maximum(s[1] / count - mean * mean, 0.0)     # biased var (BN training mode)
    scale = gamma * jax.lax.rsqrt(var + eps)
    shift = beta - mean * scale
    return scale.reshape(1, -1), shift.reshape(1, -1)


def _fold_ds_weights(dw, db, pw, pb, cin, K):
    """Fold 3x3 depthwise (kernels_per_layer=K) + 1x1 pointwise into one dense 3x3 conv.
    Returns (wf (3,3,cin,cout) f32, bf (cout,) f32)."""
    cout = pw.shape[1]
    dw_r = dw.reshape(3, 3, cin, K)
    pw_r = pw.reshape(cin, K, cout)
    wf = jnp.einsum('hwck,cko->hwco', dw_r, pw_r)
    bf = db @ pw + pb
    return wf, bf


def _pack_conv_params(wf, bf, cin_p, cout_p):
    """Lane-pad + reshape to the kernel layout: ((9, cin_p, cout_p) bf16, (1, cout_p) f32)."""
    cin, cout = wf.shape[2], wf.shape[3]
    wf_p = jnp.zeros((3, 3, cin_p, cout_p), jnp.float32).at[:, :, :cin, :cout].set(wf)
    bf_p = jnp.zeros((1, cout_p), jnp.float32).at[0, :cout].set(bf)
    return wf_p.reshape(9, cin_p, cout_p).astype(jnp.bfloat16), bf_p


def _pad_vec(v, c_p):
    c = v.shape[0]
    if c == c_p:
        return v.astype(jnp.float32)
    # Padded lanes get gamma=beta=0 so their BN output is provably zero.
    return jnp.zeros((c_p,), jnp.float32).at[:c].set(v)


# ----------------------------------------------------------------------------
# Parameter init (deterministic, PyTorch-like fan-in uniform) and forward pass.
# ----------------------------------------------------------------------------
def init_double_conv_ds(key, in_channels, out_channels, mid_channels=None,
                        kernels_per_layer=1):
    if not mid_channels:
        mid_channels = out_channels
    K = kernels_per_layer
    keys = jax.random.split(key, 8)

    def uni(k, shape, fan_in):
        bound = 1.0 / jnp.sqrt(jnp.asarray(fan_in, jnp.float32))
        return jax.random.uniform(k, shape, jnp.float32, -bound, bound)

    p = {"K": K}
    p["dw1"] = uni(keys[0], (3, 3, in_channels * K), 9)        # depthwise fan_in = 1*3*3
    p["db1"] = uni(keys[1], (in_channels * K,), 9)
    p["pw1"] = uni(keys[2], (in_channels * K, mid_channels), in_channels * K)
    p["pb1"] = uni(keys[3], (mid_channels,), in_channels * K)
    p["gamma1"] = jnp.ones((mid_channels,), jnp.float32)
    p["beta1"] = jnp.zeros((mid_channels,), jnp.float32)
    p["dw2"] = uni(keys[4], (3, 3, mid_channels * K), 9)
    p["db2"] = uni(keys[5], (mid_channels * K,), 9)
    p["pw2"] = uni(keys[6], (mid_channels * K, out_channels), mid_channels * K)
    p["pb2"] = uni(keys[7], (out_channels,), mid_channels * K)
    p["gamma2"] = jnp.ones((out_channels,), jnp.float32)
    p["beta2"] = jnp.zeros((out_channels,), jnp.float32)
    return p


def double_conv_ds_forward(params, x_nchw):
    """Forward of DoubleConvDS. Input/output are NCHW like the PyTorch module."""
    K = params["K"]
    N, Cin, H, W = x_nchw.shape
    Cmid = params["gamma1"].shape[0]
    Cout = params["gamma2"].shape[0]
    cin_p = _pad_channels(Cin)
    cmid_p = _pad_channels(Cmid)
    cout_p = _pad_channels(Cout)

    # NCHW -> NHWC; channels lane-padded only when larger than one lane group.
    x = jnp.transpose(x_nchw, (0, 2, 3, 1)).astype(jnp.float32)
    if cin_p != Cin:
        x = jnp.pad(x, ((0, 0), (0, 0), (0, 0), (0, cin_p - Cin)))

    wf1, bf1 = _fold_ds_weights(params["dw1"], params["db1"], params["pw1"],
                                params["pb1"], Cin, K)
    wf2, bf2 = _fold_ds_weights(params["dw2"], params["db2"], params["pw2"],
                                params["pb2"], Cmid, K)
    w1, b1 = _pack_conv_params(wf1, bf1, cin_p, cmid_p)
    w2, b2 = _pack_conv_params(wf2, bf2, cmid_p, cout_p)
    g1, be1 = _pad_vec(params["gamma1"], cmid_p), _pad_vec(params["beta1"], cmid_p)
    g2, be2 = _pad_vec(params["gamma2"], cout_p), _pad_vec(params["beta2"], cout_p)

    ones = jnp.ones((1, cin_p), jnp.float32)
    zeros = jnp.zeros((1, cin_p), jnp.float32)

    # conv1 (+ per-tile BN1 statistics); intermediate stored as bf16.
    y1, st1 = fused_dsconv(x, w1, b1, ones, zeros, apply_input_bnrelu=False)
    s1, sh1 = _bn_scale_shift(st1, N * H * W, g1, be1)

    # BN1 + ReLU fused into conv2's input load; conv2 (+ per-tile BN2 statistics).
    y2, st2 = fused_dsconv(y1, w2, b2, s1, sh1, apply_input_bnrelu=True)
    s2, sh2 = _bn_scale_shift(st2, N * H * W, g2, be2)

    # Final BN2 + ReLU; emits only the real Cout channels in f32.
    a2 = bn_relu(y2, s2, sh2, Cout, jnp.float32)

    # NHWC -> NCHW.
    return jnp.transpose(a2, (0, 3, 1, 2)).astype(x_nchw.dtype)


# ----------------------------------------------------------------------------
# Pure-JAX references for the correctness self-check.
# ----------------------------------------------------------------------------
def _reference_forward_f32(params, x_nchw):
    """Full-f32 mirror of the PyTorch module (depthwise -> pointwise -> BN -> ReLU, x2)."""
    K = params["K"]

    def dsconv_ref(x, dw, db, pw, pb):
        N, H, W, C = x.shape
        xr = jnp.repeat(x, K, axis=-1)
        xp = jnp.pad(xr, ((0, 0), (1, 1), (1, 1), (0, 0)))
        acc = jnp.zeros((N, H, W, C * K), jnp.float32)
        for kh in range(3):
            for kw in range(3):
                acc = acc + xp[:, kh:kh + H, kw:kw + W, :] * dw[kh, kw]
        acc = acc + db
        return acc @ pw + pb

    def bn_relu_ref(y, gamma, beta):
        mean = jnp.mean(y, axis=(0, 1, 2))
        var = jnp.mean((y - mean) ** 2, axis=(0, 1, 2))
        return jnp.maximum((y - mean) * jax.lax.rsqrt(var + BN_EPS) * gamma + beta, 0.0)

    x = jnp.transpose(x_nchw, (0, 2, 3, 1)).astype(jnp.float32)
    y1 = dsconv_ref(x, params["dw1"], params["db1"], params["pw1"], params["pb1"])
    a1 = bn_relu_ref(y1, params["gamma1"], params["beta1"])
    y2 = dsconv_ref(a1, params["dw2"], params["db2"], params["pw2"], params["pb2"])
    a2 = bn_relu_ref(y2, params["gamma2"], params["beta2"])
    return jnp.transpose(a2, (0, 3, 1, 2))


def _reference_forward_bf16(params, x_nchw):
    """Mirror of the Pallas kernels' precision choices (fused bf16 conv weights, bf16
    activation operands, f32 accumulation/statistics, bf16 intermediate storage)."""
    K = params["K"]

    def conv3x3(x, wf, bf):
        N, H, W, _ = x.shape
        xp = jnp.pad(x, ((0, 0), (1, 1), (1, 1), (0, 0))).astype(jnp.bfloat16)
        w = wf.astype(jnp.bfloat16)
        acc = jnp.zeros((N, H, W, wf.shape[-1]), jnp.float32)
        for kh in range(3):
            for kw in range(3):
                acc = acc + jnp.einsum('nhwc,co->nhwo', xp[:, kh:kh + H, kw:kw + W, :],
                                       w[kh, kw], preferred_element_type=jnp.float32)
        return acc + bf

    def bn_scale_shift(y, gamma, beta):
        cnt = y.shape[0] * y.shape[1] * y.shape[2]
        s = jnp.sum(y, axis=(0, 1, 2))
        ss = jnp.sum(y * y, axis=(0, 1, 2))
        mean = s / cnt
        var = jnp.maximum(ss / cnt - mean * mean, 0.0)
        scale = gamma * jax.lax.rsqrt(var + BN_EPS)
        return scale, beta - mean * scale

    x = jnp.transpose(x_nchw, (0, 2, 3, 1)).astype(jnp.float32)
    wf1, bf1 = _fold_ds_weights(params["dw1"], params["db1"], params["pw1"],
                                params["pb1"], x.shape[-1], K)
    wf2, bf2 = _fold_ds_weights(params["dw2"], params["db2"], params["pw2"],
                                params["pb2"], wf1.shape[-1], K)

    y1 = conv3x3(x, wf1, bf1)
    s1, sh1 = bn_scale_shift(y1, params["gamma1"], params["beta1"])
    a1 = jnp.maximum(y1.astype(jnp.bfloat16).astype(jnp.float32) * s1 + sh1, 0.0)
    y2 = conv3x3(a1, wf2, bf2)
    s2, sh2 = bn_scale_shift(y2, params["gamma2"], params["beta2"])
    a2 = jnp.maximum(y2.astype(jnp.bfloat16).astype(jnp.float32) * s2 + sh2, 0.0)
    return jnp.transpose(a2, (0, 3, 1, 2))


if __name__ == "__main__":
    key = jax.random.PRNGKey(0)
    kx, kp = jax.random.split(key)
    N, Cin, H, W = 2, 4, 16, 16
    Cout = 8  # mid_channels defaults to out_channels
    x = jax.random.normal(kx, (N, Cin, H, W), jnp.float32)
    params = init_double_conv_ds(kp, Cin, Cout)

    out = double_conv_ds_forward(params, x)
    jax.block_until_ready(out)
    assert out.shape == (N, Cout, H, W), out.shape
    assert bool(jnp.all(out >= 0.0))  # ReLU output

    # Tight check vs a reference mirroring the kernel's bf16 MXU precision choices.
    ref_bf16 = _reference_forward_bf16(params, x)
    assert bool(jnp.allclose(out, ref_bf16, rtol=3e-3, atol=3e-3)), \
        float(jnp.max(jnp.abs(out - ref_bf16)))
    # Loose sanity check vs the full-f32 PyTorch-semantics reference (bf16 matmul error).
    ref_f32 = _reference_forward_f32(params, x)
    assert bool(jnp.allclose(out, ref_f32, rtol=5e-2, atol=5e-2)), \
        float(jnp.max(jnp.abs(out - ref_f32)))
    print("KERNEL_OK")
</pallas_src>

<mosaic_0001>
module attributes {stable_mosaic.version = 11 : i64} {
  func.func @_fused_dsconv_kernel(%arg0: i32, %arg1: i32, %arg2: memref<1x8x16x4xf32, #tpu.memory_space<vmem>>, %arg3: memref<1x1x16x4xf32, #tpu.memory_space<vmem>>, %arg4: memref<1x1x16x4xf32, #tpu.memory_space<vmem>>, %arg5: memref<1x4xf32, #tpu.memory_space<vmem>>, %arg6: memref<1x4xf32, #tpu.memory_space<vmem>>, %arg7: memref<9x4x8xbf16, #tpu.memory_space<vmem>>, %arg8: memref<1x8xf32, #tpu.memory_space<vmem>>, %arg9: memref<1x8x16x8xbf16, #tpu.memory_space<vmem>>, %arg10: memref<1x1x2x8xf32, #tpu.memory_space<vmem>>) attributes {dimension_semantics = [#tpu.dimension_semantics<parallel>, #tpu.dimension_semantics<parallel>], iteration_bounds = array<i64: 2, 2>, scalar_prefetch = 0 : i64, scratch_operands = 0 : i64, tpu.core_type = #tpu.core_type<tc>, window_params = [{transform_indices = @transform_0, window_bounds = array<i64: 1, 8, 16, 4>}, {transform_indices = @transform_1, window_bounds = array<i64: 1, 1, 16, 4>}, {transform_indices = @transform_2, window_bounds = array<i64: 1, 1, 16, 4>}, {pipeline_mode = #tpu.pipeline_mode<synchronous>, transform_indices = @transform_3, window_bounds = array<i64: 1, 4>}, {pipeline_mode = #tpu.pipeline_mode<synchronous>, transform_indices = @transform_4, window_bounds = array<i64: 1, 4>}, {pipeline_mode = #tpu.pipeline_mode<synchronous>, transform_indices = @transform_5, window_bounds = array<i64: 9, 4, 8>}, {pipeline_mode = #tpu.pipeline_mode<synchronous>, transform_indices = @transform_6, window_bounds = array<i64: 1, 8>}, {transform_indices = @transform_7, window_bounds = array<i64: 1, 8, 16, 8>}, {transform_indices = @transform_8, window_bounds = array<i64: 1, 1, 2, 8>}]} {
    %c0 = arith.constant 0 : index
    %c0_0 = arith.constant 0 : index
    %c0_1 = arith.constant 0 : index
    %c0_2 = arith.constant 0 : index
    %0 = vector.load %arg2[%c0, %c0_0, %c0_1, %c0_2] : memref<1x8x16x4xf32, #tpu.memory_space<vmem>>, vector<1x8x16x4xf32>
    %1 = vector.shape_cast %0 : vector<1x8x16x4xf32> to vector<8x16x4xf32>
    %c0_3 = arith.constant 0 : index
    %c0_4 = arith.constant 0 : index
    %c0_5 = arith.constant 0 : index
    %c0_6 = arith.constant 0 : index
    %2 = vector.load %arg3[%c0_3, %c0_4, %c0_5, %c0_6] : memref<1x1x16x4xf32, #tpu.memory_space<vmem>>, vector<1x1x16x4xf32>
    %3 = vector.shape_cast %2 : vector<1x1x16x4xf32> to vector<16x4xf32>
    %c0_7 = arith.constant 0 : index
    %c0_8 = arith.constant 0 : index
    %c0_9 = arith.constant 0 : index
    %c0_10 = arith.constant 0 : index
    %4 = vector.load %arg4[%c0_7, %c0_8, %c0_9, %c0_10] : memref<1x1x16x4xf32, #tpu.memory_space<vmem>>, vector<1x1x16x4xf32>
    %5 = vector.shape_cast %4 : vector<1x1x16x4xf32> to vector<16x4xf32>
    %c0_i32 = arith.constant 0 : i32
    %6 = arith.cmpi sgt, %arg1, %c0_i32 : i32
    %cst = arith.constant 0.000000e+00 : f32
    %7 = vector.broadcast %cst : f32 to vector<16x4xf32>
    %8 = arith.select %6, %3, %7 : vector<16x4xf32>
    %c1_i32 = arith.constant 1 : i32
    %9 = arith.cmpi slt, %arg1, %c1_i32 : i32
    %cst_11 = arith.constant 0.000000e+00 : f32
    %10 = vector.broadcast %cst_11 : f32 to vector<16x4xf32>
    %11 = arith.select %9, %5, %10 : vector<16x4xf32>
    %12 = vector.shape_cast %8 : vector<16x4xf32> to vector<1x16x4xf32>
    %13 = vector.shape_cast %11 : vector<16x4xf32> to vector<1x16x4xf32>
    %14 = tpu.concatenate %12, %1, %13 in 0 : vector<1x16x4xf32>, vector<8x16x4xf32>, vector<1x16x4xf32> -> vector<10x16x4xf32>
    %cst_12 = arith.constant 0.000000e+00 : f32
    %15 = vector.broadcast %cst_12 : f32 to vector<10x1x4xf32>
    %16 = tpu.concatenate %15, %14, %15 in 1 : vector<10x1x4xf32>, vector<10x16x4xf32>, vector<10x1x4xf32> -> vector<10x18x4xf32>
    %17 = vector.extract_strided_slice %16 {offsets = [0, 0, 0], sizes = [8, 16, 4], strides = [1, 1, 1]} : vector<10x18x4xf32> to vector<8x16x4xf32>
    %18 = vector.shape_cast %17 : vector<8x16x4xf32> to vector<128x4xf32>
    %19 = arith.truncf %18 : vector<128x4xf32> to vector<128x4xbf16>
    %c0_13 = arith.constant 0 : index
    %c0_14 = arith.constant 0 : index
    %c0_15 = arith.constant 0 : index
    %20 = vector.load %arg7[%c0_13, %c0_14, %c0_15] : memref<9x4x8xbf16, #tpu.memory_space<vmem>>, vector<1x4x8xbf16>
    %21 = vector.shape_cast %20 : vector<1x4x8xbf16> to vector<4x8xbf16>
    %cst_16 = arith.constant dense<0.000000e+00> : vector<128x8xf32>
    %22 = tpu.matmul %19, %21, %cst_16 {dimension_numbers = #tpu.dot_dimension_numbers<[1], [0], [0], [1], [0, 0, 1, 1], [], []>} : vector<128x4xbf16>, vector<4x8xbf16>, vector<128x8xf32> -> vector<128x8xf32>
    %23 = vector.extract_strided_slice %16 {offsets = [0, 1, 0], sizes = [8, 16, 4], strides = [1, 1, 1]} : vector<10x18x4xf32> to vector<8x16x4xf32>
    %24 = vector.shape_cast %23 : vector<8x16x4xf32> to vector<128x4xf32>
    %25 = arith.truncf %24 : vector<128x4xf32> to vector<128x4xbf16>
    %c1 = arith.constant 1 : index
    %c0_17 = arith.constant 0 : index
    %c0_18 = arith.constant 0 : index
    %26 = vector.load %arg7[%c1, %c0_17, %c0_18] : memref<9x4x8xbf16, #tpu.memory_space<vmem>>, vector<1x4x8xbf16>
    %27 = vector.shape_cast %26 : vector<1x4x8xbf16> to vector<4x8xbf16>
    %cst_19 = arith.constant dense<0.000000e+00> : vector<128x8xf32>
    %28 = tpu.matmul %25, %27, %cst_19 {dimension_numbers = #tpu.dot_dimension_numbers<[1], [0], [0], [1], [0, 0, 1, 1], [], []>} : vector<128x4xbf16>, vector<4x8xbf16>, vector<128x8xf32> -> vector<128x8xf32>
    %29 = arith.addf %22, %28 : vector<128x8xf32>
    %30 = vector.extract_strided_slice %16 {offsets = [0, 2, 0], sizes = [8, 16, 4], strides = [1, 1, 1]} : vector<10x18x4xf32> to vector<8x16x4xf32>
    %31 = vector.shape_cast %30 : vector<8x16x4xf32> to vector<128x4xf32>
    %32 = arith.truncf %31 : vector<128x4xf32> to vector<128x4xbf16>
    %c2 = arith.constant 2 : index
    %c0_20 = arith.constant 0 : index
    %c0_21 = arith.constant 0 : index
    %33 = vector.load %arg7[%c2, %c0_20, %c0_21] : memref<9x4x8xbf16, #tpu.memory_space<vmem>>, vector<1x4x8xbf16>
    %34 = vector.shape_cast %33 : vector<1x4x8xbf16> to vector<4x8xbf16>
    %cst_22 = arith.constant dense<0.000000e+00> : vector<128x8xf32>
    %35 = tpu.matmul %32, %34, %cst_22 {dimension_numbers = #tpu.dot_dimension_numbers<[1], [0], [0], [1], [0, 0, 1, 1], [], []>} : vector<128x4xbf16>, vector<4x8xbf16>, vector<128x8xf32> -> vector<128x8xf32>
    %36 = arith.addf %29, %35 : vector<128x8xf32>
    %37 = vector.extract_strided_slice %16 {offsets = [1, 0, 0], sizes = [8, 16, 4], strides = [1, 1, 1]} : vector<10x18x4xf32> to vector<8x16x4xf32>
    %38 = vector.shape_cast %37 : vector<8x16x4xf32> to vector<128x4xf32>
    %39 = arith.truncf %38 : vector<128x4xf32> to vector<128x4xbf16>
    %c3 = arith.constant 3 : index
    %c0_23 = arith.constant 0 : index
    %c0_24 = arith.constant 0 : index
    %40 = vector.load %arg7[%c3, %c0_23, %c0_24] : memref<9x4x8xbf16, #tpu.memory_space<vmem>>, vector<1x4x8xbf16>
    %41 = vector.shape_cast %40 : vector<1x4x8xbf16> to vector<4x8xbf16>
    %cst_25 = arith.constant dense<0.000000e+00> : vector<128x8xf32>
    %42 = tpu.matmul %39, %41, %cst_25 {dimension_numbers = #tpu.dot_dimension_numbers<[1], [0], [0], [1], [0, 0, 1, 1], [], []>} : vector<128x4xbf16>, vector<4x8xbf16>, vector<128x8xf32> -> vector<128x8xf32>
    %43 = arith.addf %36, %42 : vector<128x8xf32>
    %44 = vector.extract_strided_slice %16 {offsets = [1, 1, 0], sizes = [8, 16, 4], strides = [1, 1, 1]} : vector<10x18x4xf32> to vector<8x16x4xf32>
    %45 = vector.shape_cast %44 : vector<8x16x4xf32> to vector<128x4xf32>
    %46 = arith.truncf %45 : vector<128x4xf32> to vector<128x4xbf16>
    %c4 = arith.constant 4 : index
    %c0_26 = arith.constant 0 : index
    %c0_27 = arith.constant 0 : index
    %47 = vector.load %arg7[%c4, %c0_26, %c0_27] : memref<9x4x8xbf16, #tpu.memory_space<vmem>>, vector<1x4x8xbf16>
    %48 = vector.shape_cast %47 : vector<1x4x8xbf16> to vector<4x8xbf16>
    %cst_28 = arith.constant dense<0.000000e+00> : vector<128x8xf32>
    %49 = tpu.matmul %46, %48, %cst_28 {dimension_numbers = #tpu.dot_dimension_numbers<[1], [0], [0], [1], [0, 0, 1, 1], [], []>} : vector<128x4xbf16>, vector<4x8xbf16>, vector<128x8xf32> -> vector<128x8xf32>
    %50 = arith.addf %43, %49 : vector<128x8xf32>
    %51 = vector.extract_strided_slice %16 {offsets = [1, 2, 0], sizes = [8, 16, 4], strides = [1, 1, 1]} : vector<10x18x4xf32> to vector<8x16x4xf32>
    %52 = vector.shape_cast %51 : vector<8x16x4xf32> to vector<128x4xf32>
    %53 = arith.truncf %52 : vector<128x4xf32> to vector<128x4xbf16>
    %c5 = arith.constant 5 : index
    %c0_29 = arith.constant 0 : index
    %c0_30 = arith.constant 0 : index
    %54 = vector.load %arg7[%c5, %c0_29, %c0_30] : memref<9x4x8xbf16, #tpu.memory_space<vmem>>, vector<1x4x8xbf16>
    %55 = vector.shape_cast %54 : vector<1x4x8xbf16> to vector<4x8xbf16>
    %cst_31 = arith.constant dense<0.000000e+00> : vector<128x8xf32>
    %56 = tpu.matmul %53, %55, %cst_31 {dimension_numbers = #tpu.dot_dimension_numbers<[1], [0], [0], [1], [0, 0, 1, 1], [], []>} : vector<128x4xbf16>, vector<4x8xbf16>, vector<128x8xf32> -> vector<128x8xf32>
    %57 = arith.addf %50, %56 : vector<128x8xf32>
    %58 = vector.extract_strided_slice %16 {offsets = [2, 0, 0], sizes = [8, 16, 4], strides = [1, 1, 1]} : vector<10x18x4xf32> to vector<8x16x4xf32>
    %59 = vector.shape_cast %58 : vector<8x16x4xf32> to vector<128x4xf32>
    %60 = arith.truncf %59 : vector<128x4xf32> to vector<128x4xbf16>
    %c6 = arith.constant 6 : index
    %c0_32 = arith.constant 0 : index
    %c0_33 = arith.constant 0 : index
    %61 = vector.load %arg7[%c6, %c0_32, %c0_33] : memref<9x4x8xbf16, #tpu.memory_space<vmem>>, vector<1x4x8xbf16>
    %62 = vector.shape_cast %61 : vector<1x4x8xbf16> to vector<4x8xbf16>
    %cst_34 = arith.constant dense<0.000000e+00> : vector<128x8xf32>
    %63 = tpu.matmul %60, %62, %cst_34 {dimension_numbers = #tpu.dot_dimension_numbers<[1], [0], [0], [1], [0, 0, 1, 1], [], []>} : vector<128x4xbf16>, vector<4x8xbf16>, vector<128x8xf32> -> vector<128x8xf32>
    %64 = arith.addf %57, %63 : vector<128x8xf32>
    %65 = vector.extract_strided_slice %16 {offsets = [2, 1, 0], sizes = [8, 16, 4], strides = [1, 1, 1]} : vector<10x18x4xf32> to vector<8x16x4xf32>
    %66 = vector.shape_cast %65 : vector<8x16x4xf32> to vector<128x4xf32>
    %67 = arith.truncf %66 : vector<128x4xf32> to vector<128x4xbf16>
    %c7 = arith.constant 7 : index
    %c0_35 = arith.constant 0 : index
    %c0_36 = arith.constant 0 : index
    %68 = vector.load %arg7[%c7, %c0_35, %c0_36] : memref<9x4x8xbf16, #tpu.memory_space<vmem>>, vector<1x4x8xbf16>
    %69 = vector.shape_cast %68 : vector<1x4x8xbf16> to vector<4x8xbf16>
    %cst_37 = arith.constant dense<0.000000e+00> : vector<128x8xf32>
    %70 = tpu.matmul %67, %69, %cst_37 {dimension_numbers = #tpu.dot_dimension_numbers<[1], [0], [0], [1], [0, 0, 1, 1], [], []>} : vector<128x4xbf16>, vector<4x8xbf16>, vector<128x8xf32> -> vector<128x8xf32>
    %71 = arith.addf %64, %70 : vector<128x8xf32>
    %72 = vector.extract_strided_slice %16 {offsets = [2, 2, 0], sizes = [8, 16, 4], strides = [1, 1, 1]} : vector<10x18x4xf32> to vector<8x16x4xf32>
    %73 = vector.shape_cast %72 : vector<8x16x4xf32> to vector<128x4xf32>
    %74 = arith.truncf %73 : vector<128x4xf32> to vector<128x4xbf16>
    %c8 = arith.constant 8 : index
    %c0_38 = arith.constant 0 : index
    %c0_39 = arith.constant 0 : index
    %75 = vector.load %arg7[%c8, %c0_38, %c0_39] : memref<9x4x8xbf16, #tpu.memory_space<vmem>>, vector<1x4x8xbf16>
    %76 = vector.shape_cast %75 : vector<1x4x8xbf16> to vector<4x8xbf16>
    %cst_40 = arith.constant dense<0.000000e+00> : vector<128x8xf32>
    %77 = tpu.matmul %74, %76, %cst_40 {dimension_numbers = #tpu.dot_dimension_numbers<[1], [0], [0], [1], [0, 0, 1, 1], [], []>} : vector<128x4xbf16>, vector<4x8xbf16>, vector<128x8xf32> -> vector<128x8xf32>
    %78 = arith.addf %71, %77 : vector<128x8xf32>
    %c0_41 = arith.constant 0 : index
    %c0_42 = arith.constant 0 : index
    %79 = vector.load %arg8[%c0_41, %c0_42] : memref<1x8xf32, #tpu.memory_space<vmem>>, vector<1x8xf32>
    %80 = vector.shape_cast %79 : vector<1x8xf32> to vector<8xf32>
    %81 = vector.shape_cast %80 : vector<8xf32> to vector<1x8xf32>
    %82 = vector.broadcast %81 : vector<1x8xf32> to vector<128x8xf32>
    %83 = arith.addf %78, %82 : vector<128x8xf32>
    %84 = vector.shape_cast %83 : vector<128x8xf32> to vector<8x16x8xf32>
    %85 = arith.truncf %84 : vector<8x16x8xf32> to vector<8x16x8xbf16>
    %c0_43 = arith.constant 0 : index
    %c0_44 = arith.constant 0 : index
    %c0_45 = arith.constant 0 : index
    %c0_46 = arith.constant 0 : index
    %86 = vector.load %arg9[%c0_43, %c0_44, %c0_45, %c0_46] : memref<1x8x16x8xbf16, #tpu.memory_space<vmem>>, vector<1x8x16x8xbf16>
    %87 = vector.shape_cast %86 : vector<1x8x16x8xbf16> to vector<8x16x8xbf16>
    %88 = vector.shape_cast %85 : vector<8x16x8xbf16> to vector<1x8x16x8xbf16>
    tpu.vector_store %arg9[%c0_43, %c0_44, %c0_45, %c0_46], %88 {strides = array<i32>} : memref<1x8x16x8xbf16, #tpu.memory_space<vmem>>, vector<1x8x16x8xbf16>,
    %cst_47 = arith.constant dense<0.000000e+00> : vector<8xf32>
    %89 = vector.multi_reduction <add>, %83, %cst_47 [0] : vector<128x8xf32> to vector<8xf32>
    %90 = vector.shape_cast %89 : vector<8xf32> to vector<1x8xf32>
    %91 = arith.mulf %83, %83 : vector<128x8xf32>
    %cst_48 = arith.constant dense<0.000000e+00> : vector<8xf32>
    %92 = vector.multi_reduction <add>, %91, %cst_48 [0] : vector<128x8xf32> to vector<8xf32>
    %93 = vector.shape_cast %92 : vector<8xf32> to vector<1x8xf32>
    %94 = tpu.concatenate %90, %93 in 0 : vector<1x8xf32>, vector<1x8xf32> -> vector<2x8xf32>
    %c0_49 = arith.constant 0 : index
    %c0_50 = arith.constant 0 : index
    %c0_51 = arith.constant 0 : index
    %c0_52 = arith.constant 0 : index
    %95 = vector.load %arg10[%c0_49, %c0_50, %c0_51, %c0_52] : memref<1x1x2x8xf32, #tpu.memory_space<vmem>>, vector<1x1x2x8xf32>
    %96 = vector.shape_cast %95 : vector<1x1x2x8xf32> to vector<2x8xf32>
    %97 = vector.shape_cast %94 : vector<2x8xf32> to vector<1x1x2x8xf32>
    tpu.vector_store %arg10[%c0_49, %c0_50, %c0_51, %c0_52], %97 {strides = array<i32>} : memref<1x1x2x8xf32, #tpu.memory_space<vmem>>, vector<1x1x2x8xf32>,
    return
  }
  func.func @transform_0(%arg0: i32, %arg1: i32) -> (i32, i32, i32, i32) {
    %c0_i32 = arith.constant 0 : i32
    %c0_i32_0 = arith.constant 0 : i32
    %c0_i32_1 = arith.constant 0 : i32
    return %arg0, %arg1, %c0_i32, %c0_i32_0 : i32, i32, i32, i32
  }
  func.func @transform_1(%arg0: i32, %arg1: i32) -> (i32, i32, i32, i32) {
    %c8_i32 = arith.constant 8 : i32
    %0 = arith.muli %arg1, %c8_i32 : i32
    %c1_i32 = arith.constant 1 : i32
    %1 = arith.subi %0, %c1_i32 : i32
    %c0_i32 = arith.constant 0 : i32
    %2 = arith.maxsi %1, %c0_i32 : i32
    %c0_i32_0 = arith.constant 0 : i32
    %c0_i32_1 = arith.constant 0 : i32
    %c0_i32_2 = arith.constant 0 : i32
    return %arg0, %2, %c0_i32_0, %c0_i32_1 : i32, i32, i32, i32
  }
  func.func @transform_2(%arg0: i32, %arg1: i32) -> (i32, i32, i32, i32) {
    %c1_i32 = arith.constant 1 : i32
    %0 = arith.addi %arg1, %c1_i32 : i32
    %c8_i32 = arith.constant 8 : i32
    %1 = arith.muli %0, %c8_i32 : i32
    %c15_i32 = arith.constant 15 : i32
    %2 = arith.minsi %1, %c15_i32 : i32
    %c0_i32 = arith.constant 0 : i32
    %c0_i32_0 = arith.constant 0 : i32
    %c0_i32_1 = arith.constant 0 : i32
    return %arg0, %2, %c0_i32, %c0_i32_0 : i32, i32, i32, i32
  }
  func.func @transform_3(%arg0: i32, %arg1: i32) -> (i32, i32) {
    %c0_i32 = arith.constant 0 : i32
    %c0_i32_0 = arith.constant 0 : i32
    %c0_i32_1 = arith.constant 0 : i32
    return %c0_i32, %c0_i32_0 : i32, i32
  }
  func.func @transform_4(%arg0: i32, %arg1: i32) -> (i32, i32) {
    %c0_i32 = arith.constant 0 : i32
    %c0_i32_0 = arith.constant 0 : i32
    %c0_i32_1 = arith.constant 0 : i32
    return %c0_i32, %c0_i32_0 : i32, i32
  }
  func.func @transform_5(%arg0: i32, %arg1: i32) -> (i32, i32, i32) {
    %c0_i32 = arith.constant 0 : i32
    %c0_i32_0 = arith.constant 0 : i32
    %c0_i32_1 = arith.constant 0 : i32
    %c0_i32_2 = arith.constant 0 : i32
    return %c0_i32, %c0_i32_0, %c0_i32_1 : i32, i32, i32
  }
  func.func @transform_6(%arg0: i32, %arg1: i32) -> (i32, i32) {
    %c0_i32 = arith.constant 0 : i32
    %c0_i32_0 = arith.constant 0 : i32
    %c0_i32_1 = arith.constant 0 : i32
    return %c0_i32, %c0_i32_0 : i32, i32
  }
  func.func @transform_7(%arg0: i32, %arg1: i32) -> (i32, i32, i32, i32) {
    %c0_i32 = arith.constant 0 : i32
    %c0_i32_0 = arith.constant 0 : i32
    %c0_i32_1 = arith.constant 0 : i32
    return %arg0, %arg1, %c0_i32, %c0_i32_0 : i32, i32, i32, i32
  }
  func.func @transform_8(%arg0: i32, %arg1: i32) -> (i32, i32, i32, i32) {
    %c0_i32 = arith.constant 0 : i32
    %c0_i32_0 = arith.constant 0 : i32
    %c0_i32_1 = arith.constant 0 : i32
    return %arg0, %arg1, %c0_i32, %c0_i32_0 : i32, i32, i32, i32
  }
}

</mosaic_0001>

<bundles_post_ra>
// kernel: tpu_custom_call.1
= control target key start
LH: loop header
LB: loop body
LE: loop exit
PB: predicated region body
PF: predicated region fallthrough
CT: control target
= control target key end

     0   :  { %14 = vsyncpa [#allocation3], 0  ;;  %s3824_s0 = inlined_call_operand.vmem [shape: f32[2,16,16,4], index: 0, kind: input, shape index: {}]   ;;  %s3825_s1 = inlined_call_operand.vmem [shape: f32[2,16,16,4], index: 1, kind: input, shape index: {}]   ;;  %s3826_s2 = inlined_call_operand.vmem [shape: f32[2,16,16,4], index: 2, kind: input, shape index: {}]   ;;  %s3827_s3 = inlined_call_operand.vmem [shape: f32[1,4], index: 3, kind: input, shape index: {}]   ;;  %s3828_s4 = inlined_call_operand.vmem [shape: f32[1,4], index: 4, kind: input, shape index: {}]   ;;  %s3829_s5 = inlined_call_operand.vmem [shape: bf16[9,4,8], index: 5, kind: input, shape index: {}]   ;;  %s3830_s6 = inlined_call_operand.vmem [shape: f32[1,8], index: 6, kind: input, shape index: {}]   ;;  %s3831_s7 = inlined_call_operand.vmem [shape: bf16[2,16,16,8], index: 7, kind: output, shape index: {0}]   ;;  %s3832_s8 = inlined_call_operand.hbm [shape: f32[2,2,2,8], index: 8, kind: output, shape index: {1}]  }
   0x1   :  { %16 = vsyncpa [#allocation3 + $0x1], 0  ;;  %s3098_s27 = smov 0   ;;  %s3100_s3 = smov 0  }
   0x2   :  { %s3102_s28 = smov 0   ;;  %s3104_s4 = smov 0  }
   0x3   :  { %s3106_s29 = smov 0   ;;  %s3108_s30 = smov 0  }
   0x4   :  { %s3110_s9 = smov 0   ;;  %s3112_s10 = smov 0  }
   0x5 LB: > { %s2327_s11 = sadd.s32 4294967295, %s3050_s10   ;;  %s2328_s12 = sadd.s32 4294967294, %s3050_s10   ;;  %s3050_s10 = sphi %s3112_s10, %s22_s10   ;;  %s3046_s9 = sphi %s3110_s9, %s3842_s9   ;;  %s3042_s30 = sphi %s3108_s30, %s3841_s30   ;;  %s3038_s29 = sphi %s3106_s29, %s3840_s29   ;;  %s3034_s4 = sphi %s3104_s4, %s3839_s4   ;;  %s3030_s28 = sphi %s3102_s28, %s3838_s28   ;;  %s3026_s3 = sphi %s3100_s3, %s3837_s3   ;;  %s3022_s27 = sphi %s3098_s27, %s3836_s27  }
   0x6   : > { %s31_s13 = sadd.s32 1, %s3042_s30  ;;  %s34_s14 = sadd.s32 1, %s3046_s9 }
   0x7   : > { %p32_p0 = scmp.ge.s32.totalorder %s31_s13, 2  ;;  %p265_p1 = scmp.ne.s32.totalorder %s3030_s28, %s3026_s3 }
   0x8   : > { %p266_p2 = scmp.eq.s32.totalorder %s2327_s11, 3  ;;  %p271_p5 = scmp.ne.s32.totalorder %s3026_s3, %s3022_s27 }
   0x9   : > { %s3844_s13 = smov (%p32_p0, %s31_s13), 0  ;;  %s3846_s14 = smov (!%p32_p0, %s34_s14), %s3046_s9 }
   0xa   : > { %s251_s15 = ssub.s32 %s3042_s30, %s3844_s13  ;;  %p3149_p3 = por %p266_p2, %p265_p1 }
   0xb   : > { %p36_p4 = scmp.ge.s32.totalorder %s3846_s14, 2  ;;  %p272_p6 = scmp.eq.s32.totalorder %s2328_s12, 3 }
   0xc   : > { %p2337_p7 = scmp.ge.s32.totalorder %s3050_s10, 1  ;;  %p356_p9 = scmp.lt.s32.totalorder %s3050_s10, 5 }
   0xd   : > { %s3848_s14 = smov (%p36_p4, %s3846_s14), 0  ;;  %p3158_p8 = por %p272_p6, %p271_p5 }
   0xe   : > { %s250_s18 = ssub.s32 %s3046_s9, %s3848_s14  ;;  %s255_s19 = sadd.s32 1, %s3030_s28 }
   0xf   : > { %s252_s20 = sor.u32 %s251_s15, %s250_s18  ;;  %p357_p10 = pnand %p2337_p7, %p356_p9 }
  0x10   : > { %p253_p11 = scmp.eq.s32.totalorder %s252_s20, 0  ;;  %vm738_vm0 = vcmask (!%p357_p10), 1041408   ;;  %v3172_v0 = vld [vmem:[%s3829_s5 + $0x8] sm:$0x3] (!%p357_p10)  ;;  %v2364_v1 = vld [vmem:[%s3829_s5 + $0x2] sm:$0x3] (!%p357_p10) }
  0x11   : > { %360 = sbr.rel (%p357_p10) target bundleno = 442 (0x1ba), region = 48  ;;  %s3178_s26 = sshll.u32 (!%p357_p10), %s3034_s4, 3  ;;  %2867 = vmatprep.subr.msk.bf16.mxu0 (!%p357_p10), %vm738_vm0, %v3172_v0  ;;  %v3184_v2 = vsel (!%p357_p10), %vm738_vm0, %v3172_v0, 0  ;;  %2863 = vmatprep.subr.msk.bf16.mxu1 (!%p357_p10), %vm738_vm0, %v2364_v1  ;;  %v740_v3 = vsel (!%p357_p10), %vm738_vm0, %v2364_v1, 0  ;;  %v3195_v4 = vld [vmem:[%s3829_s5] sm:$0x3] (!%p357_p10) }
  0x12   : > { %s3167_s21 = scalar_select %p253_p11, %s3030_s28, %s255_s19  }
  0x13   : > { %p432_p12 = scmp.lt.s32.totalorder (!%p357_p10), %s3038_s29, 1  ;;  %p434_p13 = scmp.lt.s32.totalorder (!%p357_p10), %s3178_s26, 15  ;;  %2644 = vmatpush3.bf16.msra.mxu0 (!%p357_p10), %v3184_v2  ;;  %2572 = vmatpush3.bf16.msra.mxu1 (!%p357_p10), %v740_v3  ;;  %v2408_v5 = vld [vmem:[%s3829_s5 + $0xa] sm:$0x3] (!%p357_p10)  ;;  %vm540_vm1 = vcmask (!%p357_p10), 1040384   ;;  %vm646_vm2 = vcmask (!%p357_p10), 1046528  }
  0x14   : > { %s2344_s11 = sadd.s32 (!%p357_p10), 4294967295, %s3178_s26  ;;  %2864 = vmatprep.subr.msk.bf16.mxu1 (!%p357_p10), %vm738_vm0, %v3195_v4  ;;  %2869 = vmatprep.subr.msk.bf16.mxu0 (!%p357_p10), %vm738_vm0, %v2408_v5  ;;  %p508_p1 = scmp.gt.s32.totalorder (!%p357_p10), %s3034_s4, 0  ;;  %vm713_vm3 = vcmask (!%p357_p10), 31744   ;;  %v1437_v22 = vsel (!%p357_p10), %vm738_vm0, %v2408_v5, 0  ;;  %vm963_vm4 = vcmask (!%p357_p10), 1045504   ;;  %vm2021_vm5 = vcmask (!%p357_p10), 60416  }
  0x15   : > { %p444_p0 = scmp.gt.s32.totalorder (!%p357_p10), %s2344_s11, 0  ;;  %p2345_p2 = scmp.lt.s32.totalorder (!%p357_p10), %s2344_s11, 15  ;;  %v3293_v51 = vld [vmem:[%s3829_s5 + $0xc] sm:$0x3] (!%p357_p10)  ;;  %vm2038_vm6 = vcmask (!%p357_p10), 64512   ;;  %vm2130_vm7 = vcmask (!%p357_p10), 58368  }
  0x16   : > { %p514_p5 = scmp.lt.s32.totalorder (!%p357_p10), %s3034_s4, 1 }
  0x18   : > { %s433_s18 = scalar_select %p432_p12, %s3038_s29, 1 }
  0x19   : > { %s435_s22 = scalar_select %p434_p13, %s3178_s26, 15 }
  0x1a   : > { %s3205_s23 = sshll.u32 %s433_s18, 5  ;;  %s3850_s11 = smov (!%p444_p0, %s2344_s11), 0 }
  0x1b   : > { %s2340_s24 = sshll.u32 %s435_s22, 1  ;;  %s3852_s11 = smov (!%p2345_p2, %s3850_s11), 15 }
  0x1c   : > { %s3208_s25 = sadd.s32 %s3205_s23, %s2340_s24  ;;  %s2473_s18 = sadd.s32 8, %s3178_s26 }
  0x1d   : > { %s2342_s12 = sshll.u32 %s3208_s25, 3  ;;  %s2350_s22 = sshll.u32 %s3852_s11, 1 }
  0x1e   : > { %s3215_s20 = scalar_lea.vmem %s3824_s0, %s2342_s12  ;;  %s452_s24 = sadd.s32 %s2350_s22, %s3205_s23 }
  0x1f   : > { %v488_v6 = vld [vmem:[%s3215_s20] sm:$0xff]  ;;  %v489_v7 = vld [vmem:[%s3215_s20 + $0x8] sm:$0xff]  ;;  %v490_v8 = vld [vmem:[%s3215_s20 + $0x10] sm:$0xff]  ;;  %s2352_s11 = sshll.u32 %s452_s24, 3  ;;  %p3252_p4 = scmp.lt.s32.totalorder %s2473_s18, 15 }
  0x20   : > { %v544_v9 = vrot.slane %v488_v6, 7  ;;  %v545_v10 = vrot.slane %v489_v7, 7  ;;  %v491_v11 = vld [vmem:[%s3215_s20 + $0x18] sm:$0xff]  ;;  %v547_v12 = vrot.slane %v490_v8, 7  ;;  %v492_v23 = vld [vmem:[%s3215_s20 + $0x20] sm:$0xff]  ;;  %v493_v28 = vld [vmem:[%s3215_s20 + $0x28] sm:$0xff]  ;;  %s454_s22 = scalar_lea.vmem %s3825_s1, %s2352_s11 }
  0x21   : > { %v548_v13 = vrot.slane %v491_v11, 7  ;;  %v494_v33 = vld [vmem:[%s3215_s20 + $0x30] sm:$0xff]  ;;  %v495_v34 = vld [vmem:[%s3215_s20 + $0x38] sm:$0xff]  ;;  %s2945_s24 = scalar_select %p508_p1, 255, 0  ;;  %v550_v37 = vrot.slane %v492_v23, 7 }
  0x22   : > { %v3222_v14 = vsel %vm540_vm1, %v544_v9, %v545_v10  ;;  %v3225_v15 = vsel %vm540_vm1, 0.0, %v544_v9  ;;  %v3228_v16 = vsel %vm540_vm1, %v545_v10, 0.0  ;;  %v3231_v17 = vsel %vm540_vm1, 0.0, %v547_v12  ;;  %s3854_s18 = smov (!%p3252_p4, %s2473_s18), 15 }
  0x23   : > { %v652_v18 = vrot.slane %v3225_v15, 1  ;;  %v653_v19 = vrot.slane %v3222_v14, 1  ;;  %v655_v20 = vrot.slane %v3228_v16, 1  ;;  %v3238_v21 = vsel %vm540_vm1, %v547_v12, %v548_v13  ;;  %v2946_v42 = vld [vmem:[%s454_s22] sm:%s2945_s24]  ;;  %v2949_v46 = vld [vmem:[%s454_s22 + $0x8] sm:%s2945_s24]  ;;  %s3856_s18 = smov (!%p3252_p4, %s3854_s18), 15 }
  0x24   : > { %v3246_v26 = vsel %vm540_vm1, %v548_v13, 0.0  ;;  %v657_v27 = vrot.slane %v3231_v17, 1  ;;  %v969_v30 = vrot.slane %v3225_v15, 2  ;;  %v658_v31 = vrot.slane %v3238_v21, 1  ;;  %s3324_s26 = sshll.u32 %s3856_s18, 1  ;;  %s2462_s18 = sshll.u32 %s3038_s29, 1 }
  0x25   : > { %v654_v24 = vsel %vm646_vm2, %v652_v18, %v653_v19  ;;  %v656_v25 = vsel %vm646_vm2, %v653_v19, %v655_v20  ;;  %v660_v32 = vrot.slane %v3246_v26, 1  ;;  %v970_v35 = vrot.slane %v3222_v14, 2  ;;  %s469_s12 = sadd.s32 %s3324_s26, %s3205_s23  ;;  %v496_v18 = vld [vmem:[%s3215_s20 + $0x40] sm:$0xff]  ;;  %v497_v19 = vld [vmem:[%s3215_s20 + $0x48] sm:$0xff]  ;;  %s2363_s23 = sshll.u32 %s3208_s25, 2 }
  0x26   : > { %v3256_v29 = vpack.c.bf16 %v656_v25, %v654_v24  ;;  %v972_v36 = vrot.slane %v3228_v16, 2  ;;  %v659_v38 = vsel %vm646_vm2, %v657_v27, %v658_v31  ;;  %v551_v40 = vrot.slane %v493_v28, 7  ;;  %s2359_s11 = sshll.u32 %s469_s12, 3  ;;  %s428_s25 = sand.u32 1, %s3026_s3  }
  0x27   : > { %v661_v39 = vsel %vm646_vm2, %v658_v31, %v660_v32  ;;  %v3277_v43 = vsel %vm540_vm1, 0.0, %v550_v37  ;;  %v553_v44 = vrot.slane %v494_v33, 7  ;;  %v554_v45 = vrot.slane %v495_v34, 7  ;;  %s471_s26 = scalar_lea.vmem %s3826_s2, %s2359_s11  ;;  %s2158_s19 = sadd.s32 %s3034_s4, %s2462_s18 }
  0x28   : > { %2645 = vmatprep.mubr.msk.bf16.mxu0 %vm713_vm3, %v3256_v29  ;;  %v3274_v41 = vpack.c.bf16 %v661_v39, %v659_v38  ;;  %v541_v47 = vrot.slane %v2946_v42, 7  ;;  %v3284_v48 = vsel %vm540_vm1, %v550_v37, %v551_v40  ;;  %v3287_v49 = vsel %vm540_vm1, %v551_v40, 0.0  ;;  %v498_v38 = vld [vmem:[%s3215_s20 + $0x50] sm:$0xff]  ;;  %s2951_s12 = scalar_select %p514_p5, 255, 0 }
  0x29   : > { %v662_v50 = vrot.slane %v3277_v43, 1  ;;  %v542_v52 = vrot.slane %v2949_v46, 7  ;;  %v663_v53 = vrot.slane %v3284_v48, 1  ;;  %v665_v54 = vrot.slane %v3287_v49, 1  ;;  %s2463_s22 = sshll.u32 %s2158_s19, 5  ;;  %s2143_s4 = scalar_lea.sflag [#allocation3], %s428_s25 }
  0x2a   : > { %2646 = vmatmul.mubr.msk.bf16.vlgmr.msra.gmra.mrb[0].mxu0 %vm713_vm3, %v3274_v41  ;;  %v3300_v55 = vsel %vm540_vm1, %v553_v44, %v554_v45  ;;  %v974_v56 = vrot.slane %v3231_v17, 2  ;;  %v3306_v57 = vsel %vm540_vm1, 0.0, %v541_v47  ;;  %v3309_v58 = vsel %vm540_vm1, 0.0, %v553_v44 }
  0x2b   : > { %2662 = vmatpush3.bf16.msra.mxu0 %v1437_v22  ;;  %v3312_v59 = vsel %vm540_vm1, %v554_v45, 0.0  ;;  %v3315_v60 = vsel %vm540_vm1, %v541_v47, %v542_v52  ;;  %v3318_v61 = vsel %vm540_vm1, %v542_v52, 0.0  ;;  %v647_v62 = vrot.slane %v3306_v57, 1 }
  0x2c   : > { %v668_v63 = vrot.slane %v3300_v55, 1  ;;  %2870 = vmatprep.subr.msk.bf16.mxu0 %vm738_vm0, %v3293_v51  ;;  %v975_v1 = vrot.slane %v3238_v21, 2  ;;  %v977_v3 = vrot.slane %v3246_v26, 2  ;;  %v648_v5 = vrot.slane %v3315_v60, 1 }
  0x2d   : > { %v650_v6 = vrot.slane %v3318_v61, 1  ;;  %v664_v7 = vsel %vm646_vm2, %v662_v50, %v663_v53  ;;  %v666_v8 = vsel %vm646_vm2, %v663_v53, %v665_v54  ;;  %v667_v9 = vrot.slane %v3309_v58, 1  ;;  %v500_v50 = vld [vmem:[%s3215_s20 + $0x60] sm:$0xff] }
  0x2e   : > { %v670_v10 = vrot.slane %v3312_v59, 1  ;;  %v649_v11 = vsel %vm646_vm2, %v647_v62, %v648_v5  ;;  %v3338_v13 = vpack.c.bf16 %v666_v8, %v664_v7  ;;  %v971_v16 = vsel %vm963_vm4, %v969_v30, %v970_v35 }
  0x2f   : > { %v651_v12 = vsel %vm646_vm2, %v648_v5, %v650_v6  ;;  %v669_v22 = vsel %vm646_vm2, %v667_v9, %v668_v63  ;;  %v973_v24 = vsel %vm963_vm4, %v970_v35, %v972_v36  ;;  %v864_v25 = vsel %vm738_vm0, %v3195_v4, 0  ;;  %v3361_v4 = vld [vmem:[%s3829_s5 + $0x4] sm:$0x3] }
  0x30   : > { %v703_v20 = vpack.c.bf16 %v651_v12, %v649_v11  ;;  %v671_v23 = vsel %vm646_vm2, %v668_v63, %v670_v10  ;;  %2649 = vmatprep.mubr.msk.bf16.mxu0 %vm713_vm3, %v3338_v13  ;;  %v3352_v27 = vpack.c.bf16 %v973_v24, %v971_v16  ;;  %v976_v28 = vsel %vm963_vm4, %v974_v56, %v975_v1 }
  0x31   : > { %v3350_v26 = vpack.c.bf16 %v671_v23, %v669_v22  ;;  %v978_v30 = vsel %vm963_vm4, %v975_v1, %v977_v3  ;;  %v556_v31 = vrot.slane %v496_v18, 7  ;;  %v557_v32 = vrot.slane %v497_v19, 7 }
  0x32   : > { %2573 = vmatprep.mubr.msk.bf16.mxu1 %vm713_vm3, %v703_v20  ;;  %v979_v33 = vrot.slane %v3277_v43, 2  ;;  %v980_v34 = vrot.slane %v3284_v48, 2  ;;  %v982_v35 = vrot.slane %v3287_v49, 2  ;;  %v984_v36 = vrot.slane %v3309_v58, 2  ;;  %v499_v49 = vld [vmem:[%s3215_s20 + $0x58] sm:$0xff] }
  0x33   : > { %2574 = vmatmul.mubr.msk.bf16.vlgmr.msra.gmra.mrb[0].mxu1 %vm713_vm3, %v3256_v29  ;;  %2650 = vmatmul.mubr.msk.bf16.gmra.mrb[4].mxu0 %vm713_vm3, %v3350_v26  ;;  %v985_v37 = vrot.slane %v3300_v55, 2  ;;  %v3375_v29 = vsel %vm540_vm1, %v556_v31, %v557_v32  ;;  %v3378_v39 = vsel %vm540_vm1, 0.0, %v556_v31  ;;  %v616_v40 = vsel %vm540_vm1, %v557_v32, 0.0  ;;  %v3420_v20 = vld [vmem:[%s3829_s5 + $0xe] sm:$0x3] }
  0x34   : > { %2590 = vmatpush3.bf16.msra.mxu1 %v864_v25  ;;  %2577 = vmatprep.mubr.msk.bf16.mxu1 %vm713_vm3, %v3274_v41  ;;  %v987_v42 = vrot.slane %v3312_v59, 2  ;;  %v672_v44 = vrot.slane %v3378_v39, 1  ;;  %v673_v45 = vrot.slane %v3375_v29, 1  ;;  %v675_v46 = vrot.slane %v616_v40, 1  ;;  %v501_v59 = vld [vmem:[%s3215_s20 + $0x68] sm:$0xff] }
  0x35   : > { %2663 = vmatprep.mubr.msk.bf16.mxu0 %vm713_vm3, %v3352_v27  ;;  %v981_v47 = vsel %vm963_vm4, %v979_v33, %v980_v34  ;;  %2865 = vmatprep.subr.msk.bf16.mxu1 %vm738_vm0, %v3361_v4  ;;  %v3392_v52 = vpack.c.bf16 %v978_v30, %v976_v28  ;;  %v1559_v53 = vsel %vm738_vm0, %v3293_v51, 0  ;;  %v983_v54 = vsel %vm963_vm4, %v980_v34, %v982_v35  ;;  %v502_v35 = vld [vmem:[%s3215_s20 + $0x70] sm:$0xff] }
  0x36   : > { %v559_v56 = vrot.slane %v498_v38, 7  ;;  %v674_v62 = vsel %vm646_vm2, %v672_v44, %v673_v45  ;;  %v676_v63 = vsel %vm646_vm2, %v673_v45, %v675_v46  ;;  %v986_v1 = vsel %vm963_vm4, %v984_v36, %v985_v37 }
  0x37   : > { %v988_v3 = vsel %vm963_vm4, %v985_v37, %v987_v42  ;;  %v3402_v5 = vpack.c.bf16 %v983_v54, %v981_v47  ;;  %v560_v6 = vrot.slane %v499_v49, 7  ;;  %v562_v8 = vrot.slane %v500_v50, 7  ;;  %v503_v42 = vld [vmem:[%s3215_s20 + $0x78] sm:$0xff]  ;;  %s2338_s20 = sshll.u32 %s428_s25, 1 }
  0x38   : > { %v3405_v7 = vsel %vm540_vm1, 0.0, %v559_v56  ;;  %v563_v9 = vrot.slane %v501_v59, 7  ;;  %v989_v10 = vrot.slane %v3378_v39, 2  ;;  %v990_v11 = vrot.slane %v3375_v29, 2  ;;  %s430_s24 = scalar_lea.vmem [#allocation2], %s2338_s20 }
  0x39   : > { %v677_v51 = vrot.slane %v3405_v7, 1  ;;  %v3411_v12 = vsel %vm540_vm1, %v559_v56, %v560_v6  ;;  %v617_v16 = vsel %vm540_vm1, %v560_v6, 0.0  ;;  %v3415_v18 = vsel %vm540_vm1, 0.0, %v562_v8  ;;  %s2162_s11 = sshll.u32 %s430_s24, 4  ;;  %s3772_s11 = int_to_ptr.vmem [resolvable:$true] %s2162_s11 }
  0x3a   : > { %v992_v19 = vrot.slane %v616_v40, 2  ;;  %v678_v22 = vrot.slane %v3411_v12, 1  ;;  %v680_v23 = vrot.slane %v617_v16, 1  ;;  %v3428_v24 = vsel %vm540_vm1, %v562_v8, %v563_v9  ;;  %s2956_s29 = scalar_lea.vmem %s3772_s11, 32 }
  0x3b   : > { %2578 = vmatmul.mubr.msk.bf16.gmra.mrb[4].mxu1 %vm713_vm3, %v3338_v13  ;;  %2664 = vmatmul.mubr.msk.bf16.vlgmr.msra.gmra.mrb[0].mxu0 %vm713_vm3, %v3392_v52  ;;  %v618_v25 = vsel %vm540_vm1, %v563_v9, 0.0  ;;  %v3433_v28 = vpack.c.bf16 %v676_v63, %v674_v62  ;;  %v3435_v30 = vpack.c.bf16 %v988_v3, %v986_v1  ;;  %v991_v31 = vsel %vm963_vm4, %v989_v10, %v990_v11  ;;  %p2957_p6 = scmp.ne.s32.totalorder %s3772_s11, %s2956_s29 }
  0x3c   : > { %2581 = vmatprep.mubr.msk.bf16.mxu1 %vm713_vm3, %v3350_v26  ;;  %2680 = vmatpush3.bf16.msra.mxu0 %v1559_v53  ;;  %v679_v32 = vsel %vm646_vm2, %v677_v51, %v678_v22  ;;  %v681_v33 = vsel %vm646_vm2, %v678_v22, %v680_v23  ;;  %v993_v34 = vsel %vm963_vm4, %v990_v11, %v992_v19  ;;  %v682_v36 = vrot.slane %v3415_v18, 1  ;;  %v2952_v51 = vld [vmem:[%s471_s26] sm:%s2951_s12]  ;;  %v2955_v11 = vld [vmem:[%s471_s26 + $0x8] sm:%s2951_s12]  ;;  %s3683_s12 = scalar_lea.vmem %s3831_s7, %s2363_s23  ;;  %s3770_s26 = scalar_lea.hbm %s3832_s8, %s2463_s22 }
  0x3d   : > { %2667 = vmatprep.mubr.msk.bf16.mxu0 %vm713_vm3, %v3402_v5  ;;  %2871 = vmatprep.subr.msk.bf16.mxu0 %vm738_vm0, %v3420_v20  ;;  %v683_v37 = vrot.slane %v3428_v24, 1  ;;  %v685_v38 = vrot.slane %v618_v25, 1  ;;  %v994_v40 = vrot.slane %v3405_v7, 2  ;;  %v3453_v44 = vpack.c.bf16 %v681_v33, %v679_v32  ;;  %p2958_p7 = pnand %p2957_p6, %p3149_p3 }
  0x3e   : > { %v3455_v45 = vpack.c.bf16 %v993_v34, %v991_v31  ;;  %v995_v46 = vrot.slane %v3411_v12, 2  ;;  %v997_v47 = vrot.slane %v617_v16, 2  ;;  %v999_v49 = vrot.slane %v3415_v18, 2 }
  0x3f   : > { %v1000_v50 = vrot.slane %v3428_v24, 2  ;;  %v1002_v53 = vrot.slane %v618_v25, 2  ;;  %v565_v54 = vrot.slane %v502_v35, 7  ;;  %v566_v56 = vrot.slane %v503_v42, 7  ;;  %p2959_p9 = pneg %p2958_p7 }
  0x40   : > { %v684_v59 = vsel %vm646_vm2, %v682_v36, %v683_v37  ;;  %v686_v62 = vsel %vm646_vm2, %v683_v37, %v685_v38  ;;  %v996_v63 = vsel %vm963_vm4, %v994_v40, %v995_v46  ;;  %v998_v1 = vsel %vm963_vm4, %v995_v46, %v997_v47 }
  0x41   : > { %v1001_v3 = vsel %vm963_vm4, %v999_v49, %v1000_v50  ;;  %v1003_v6 = vsel %vm963_vm4, %v1000_v50, %v1002_v53  ;;  %v3480_v8 = vsel %vm540_vm1, 0.0, %v565_v54  ;;  %v3483_v9 = vsel %vm540_vm1, %v565_v54, %v566_v56 }
  0x42   : > { %v3486_v10 = vsel %vm540_vm1, %v566_v56, 0.0  ;;  %v3488_v16 = vpack.c.bf16 %v686_v62, %v684_v59  ;;  %v3490_v19 = vpack.c.bf16 %v998_v1, %v996_v63  ;;  %v621_v22 = vpack.c.bf16 %v3315_v60, %v3306_v57 }
  0x43   : > { %2582 = vmatmul.mubr.msk.bf16.gmra.mrb[8].mxu1 %vm713_vm3, %v3433_v28  ;;  %2668 = vmatmul.mubr.msk.bf16.gmra.mrb[4].mxu0 %vm713_vm3, %v3435_v30  ;;  %v3494_v23 = vpack.c.bf16 %v1003_v6, %v1001_v3  ;;  %v1423_v25 = vrot.slane %v3480_v8, 2  ;;  %v568_v31 = vrot.slane %v2952_v51, 7  ;;  %v1424_v32 = vrot.slane %v3483_v9, 2 }
  0x44   : > { %2585 = vmatprep.mubr.msk.bf16.mxu1 %vm713_vm3, %v3453_v44  ;;  %2671 = vmatprep.mubr.msk.bf16.mxu0 %vm713_vm3, %v3455_v45  ;;  %v1426_v33 = vrot.slane %v3486_v10, 2  ;;  %v569_v34 = vrot.slane %v2955_v11, 7  ;;  %v3527_v59 = vpack.c.bf16 %v3222_v14, %v3225_v15  ;;  %v3539_v3 = vpack.c.bf16 %v3238_v21, %v3231_v17  ;;  %v2390_v15 = vld [vmem:[%s3829_s5 + $0x6] sm:$0x3]  ;;  %v2435_v11 = vld [vmem:[%s3829_s5 + $0x10] sm:$0x3] }
  0x45   : > { %v3500_v35 = vsel %vm540_vm1, 0.0, %v568_v31  ;;  %v1425_v46 = vsel %vm963_vm4, %v1423_v25, %v1424_v32  ;;  %v1055_v14 = vsel %vm738_vm0, %v3361_v4, 0  ;;  %v624_v17 = vpack.c.bf16 %v3284_v48, %v3277_v43 }
  0x46   : > { %v3503_v36 = vsel %vm540_vm1, %v568_v31, %v569_v34  ;;  %v1676_v37 = vrot.slane %v3500_v35, 1  ;;  %v1805_v38 = vrot.slane %v3500_v35, 2  ;;  %v1427_v47 = vsel %vm963_vm4, %v1424_v32, %v1426_v33 }
  0x47   : > { %v1677_v40 = vrot.slane %v3503_v36, 1  ;;  %v1806_v42 = vrot.slane %v3503_v36, 2  ;;  %v620_v49 = vsel %vm540_vm1, %v569_v34, 0.0  ;;  %v3529_v62 = vpack.c.bf16 %v1427_v47, %v1425_v46 }
  0x48   : > { %v1679_v53 = vrot.slane %v620_v49, 1  ;;  %v1808_v56 = vrot.slane %v620_v49, 2  ;;  %v625_v21 = vpack.c.bf16 %v3300_v55, %v3309_v58  ;;  %v1690_v4 = vsel %vm738_vm0, %v3420_v20, 0 }
  0x49   : > { %v3520_v50 = vsel %vm646_vm2, %v1676_v37, %v1677_v40  ;;  %v3523_v54 = vsel %vm963_vm4, %v1805_v38, %v1806_v42  ;;  %v626_v43 = vpack.c.bf16 %v3375_v29, %v3378_v39  ;;  %v627_v48 = vpack.c.bf16 %v3411_v12, %v3405_v7 }
  0x4a   : > { %v3532_v63 = vsel %vm646_vm2, %v1677_v40, %v1679_v53  ;;  %v3535_v1 = vsel %vm963_vm4, %v1806_v42, %v1808_v56  ;;  %v964_v55 = vrot.slane %v3306_v57, 2  ;;  %v965_v58 = vrot.slane %v3315_v60, 2 }
  0x4b   : > { %2586 = vmatmul.mubr.msk.bf16.gmra.mrb[12].mxu1 %vm713_vm3, %v3488_v16  ;;  %2672 = vmatmul.mubr.msk.bf16.gmra.mrb[8].mxu0 %vm713_vm3, %v3490_v19  ;;  %v1683_v6 = vpack.c.bf16 %v3532_v63, %v3520_v50  ;;  %v1812_v51 = vpack.c.bf16 %v3535_v1, %v3523_v54  ;;  %v967_v20 = vrot.slane %v3318_v61, 2  ;;  %v628_v39 = vpack.c.bf16 %v3428_v24, %v3415_v18 }
  0x4c   : > { %2591 = vmatprep.mubr.msk.bf16.mxu1 %vm713_vm3, %v621_v22  ;;  %2675 = vmatprep.mubr.msk.bf16.mxu0 %vm713_vm3, %v3494_v23  ;;  %v966_v22 = vsel %vm963_vm4, %v964_v55, %v965_v58  ;;  %v1170_v60 = vpack.c.bf16 %v3483_v9, %v3480_v8  ;;  %v1552_v61 = vpack.c.bf16 %v3503_v36, %v3500_v35  ;;  %v1177_v7 = vsel %vm738_vm0, %v2390_v15, 0 }
  0x4d   : > { %v968_v29 = vsel %vm963_vm4, %v965_v58, %v967_v20  ;;  %v1819_v12 = vsel %vm738_vm0, %v2435_v11, 0 }
  0x4e   : > { %v1020_v57 = vpack.c.bf16 %v968_v29, %v966_v22 }
  0x53   : > { %2592 = vmatmul.mubr.msk.bf16.vlgmr.msra.gmra.mrb[0].mxu1 %vm713_vm3, %v3527_v59  ;;  %2676 = vmatmul.mubr.msk.bf16.gmra.mrb[12].mxu0 %vm713_vm3, %v3529_v62 }
  0x54   : > { %2608 = vmatpush3.bf16.msra.mxu1 %v1055_v14  ;;  %2595 = vmatprep.mubr.msk.bf16.mxu1 %vm713_vm3, %v3539_v3 }
  0x55   : > { %2681 = vmatprep.mubr.msk.bf16.mxu0 %vm713_vm3, %v3539_v3  ;;  %2866 = vmatprep.subr.msk.bf16.mxu1 %vm738_vm0, %v2390_v15 }
  0x5b   : > { %2596 = vmatmul.mubr.msk.bf16.gmra.mrb[4].mxu1 %vm713_vm3, %v624_v17  ;;  %2682 = vmatmul.mubr.msk.bf16.vlgmr.msra.gmra.mrb[0].mxu0 %vm713_vm3, %v624_v17 }
  0x5c   : > { %2599 = vmatprep.mubr.msk.bf16.mxu1 %vm713_vm3, %v625_v21  ;;  %2698 = vmatpush3.bf16.msra.mxu0 %v1690_v4 }
  0x5d   : > { %2685 = vmatprep.mubr.msk.bf16.mxu0 %vm713_vm3, %v625_v21  ;;  %2872 = vmatprep.subr.msk.bf16.mxu0 %vm738_vm0, %v2435_v11 }
  0x63   : > { %2600 = vmatmul.mubr.msk.bf16.gmra.mrb[8].mxu1 %vm713_vm3, %v626_v43  ;;  %2686 = vmatmul.mubr.msk.bf16.gmra.mrb[4].mxu0 %vm713_vm3, %v626_v43 }
  0x64   : > { %2603 = vmatprep.mubr.msk.bf16.mxu1 %vm713_vm3, %v627_v48  ;;  %2689 = vmatprep.mubr.msk.bf16.mxu0 %vm713_vm3, %v627_v48 }
  0x6b   : > { %2604 = vmatmul.mubr.msk.bf16.gmra.mrb[12].mxu1 %vm713_vm3, %v628_v39  ;;  %2690 = vmatmul.mubr.msk.bf16.gmra.mrb[8].mxu0 %vm713_vm3, %v628_v39 }
  0x6c   : > { %2609 = vmatprep.mubr.msk.bf16.mxu1 %vm713_vm3, %v1020_v57  ;;  %2693 = vmatprep.mubr.msk.bf16.mxu0 %vm713_vm3, %v1170_v60 }
  0x73   : > { %2610 = vmatmul.mubr.msk.bf16.vlgmr.msra.gmra.mrb[0].mxu1 %vm713_vm3, %v3352_v27  ;;  %2694 = vmatmul.mubr.msk.bf16.gmra.mrb[12].mxu0 %vm713_vm3, %v1552_v61  ;;  %v1295_v27 = vrot.slane %v3483_v9, 1 }
  0x74   : > { %2626 = vmatpush3.bf16.msra.mxu1 %v1177_v7  ;;  %2613 = vmatprep.mubr.msk.bf16.mxu1 %vm713_vm3, %v3392_v52 }
  0x75   : > { %2699 = vmatprep.mubr.msk.bf16.mxu0 %vm713_vm3, %v3274_v41  ;;  %2868 = vmatprep.subr.msk.bf16.mxu1 %vm738_vm0, %v3172_v0  ;;  %v1294_v41 = vrot.slane %v3480_v8, 1  ;;  %v1297_v0 = vrot.slane %v3486_v10, 1 }
  0x7b   : > { %2614 = vmatmul.mubr.msk.bf16.gmra.mrb[4].mxu1 %vm713_vm3, %v3402_v5  ;;  %2700 = vmatmul.mubr.msk.bf16.vlgmr.msra.gmra.mrb[0].mxu0 %vm713_vm3, %v3338_v13  ;;  %v1296_v13 = vsel %vm646_vm2, %v1294_v41, %v1295_v27 }
  0x7c   : > { %2617 = vmatprep.mubr.msk.bf16.mxu1 %vm713_vm3, %v3435_v30  ;;  %2716 = vmatpush3.bf16.msra.mxu0 %v1819_v12 }
  0x7d   : > { %2703 = vmatprep.mubr.msk.bf16.mxu0 %vm713_vm3, %v3350_v26  ;;  %v1298_v26 = vsel %vm646_vm2, %v1295_v27, %v1297_v0 }
  0x7e   : > { %v1301_v18 = vpack.c.bf16 %v1298_v26, %v1296_v13 }
  0x83   : > { %2618 = vmatmul.mubr.msk.bf16.gmra.mrb[8].mxu1 %vm713_vm3, %v3455_v45  ;;  %2704 = vmatmul.mubr.msk.bf16.gmra.mrb[4].mxu0 %vm713_vm3, %v3433_v28 }
  0x84   : > { %2621 = vmatprep.mubr.msk.bf16.mxu1 %vm713_vm3, %v3490_v19  ;;  %2707 = vmatprep.mubr.msk.bf16.mxu0 %vm713_vm3, %v3453_v44 }
  0x8b   : > { %2622 = vmatmul.mubr.msk.bf16.gmra.mrb[12].mxu1 %vm713_vm3, %v3494_v23  ;;  %2708 = vmatmul.mubr.msk.bf16.gmra.mrb[8].mxu0 %vm713_vm3, %v3488_v16 }
  0x8c   : > { %2627 = vmatprep.mubr.msk.bf16.mxu1 %vm713_vm3, %v3527_v59  ;;  %2711 = vmatprep.mubr.msk.bf16.mxu0 %vm713_vm3, %v1301_v18 }
  0x93   : > { %2628 = vmatmul.mubr.msk.bf16.vlgmr.msra.gmra.mrb[0].mxu1 %vm713_vm3, %v3539_v3  ;;  %2712 = vmatmul.mubr.msk.bf16.gmra.mrb[12].mxu0 %vm713_vm3, %v1683_v6 }
  0x94   : > { %2734 = vmatpush3.bf16.msra.mxu1 %v3184_v2  ;;  %2631 = vmatprep.mubr.msk.bf16.mxu1 %vm713_vm3, %v624_v17 }
  0x95   : > { %2717 = vmatprep.mubr.msk.bf16.mxu0 %vm713_vm3, %v3392_v52 }
  0x9b   : > { %2632 = vmatmul.mubr.msk.bf16.gmra.mrb[4].mxu1 %vm713_vm3, %v625_v21  ;;  %2718 = vmatmul.mubr.msk.bf16.vlgmr.msra.gmra.mrb[0].mxu0 %vm713_vm3, %v3402_v5 }
  0x9c   : > { %2635 = vmatprep.mubr.msk.bf16.mxu1 %vm713_vm3, %v626_v43  ;;  %2721 = vmatprep.mubr.msk.bf16.mxu0 %vm713_vm3, %v3435_v30 }
  0xa3   : > { %2636 = vmatmul.mubr.msk.bf16.gmra.mrb[8].mxu1 %vm713_vm3, %v627_v48  ;;  %2722 = vmatmul.mubr.msk.bf16.gmra.mrb[4].mxu0 %vm713_vm3, %v3455_v45 }
  0xa4   : > { %2639 = vmatprep.mubr.msk.bf16.mxu1 %vm713_vm3, %v628_v39  ;;  %2725 = vmatprep.mubr.msk.bf16.mxu0 %vm713_vm3, %v3490_v19 }
  0xab   : > { %2640 = vmatmul.mubr.msk.bf16.gmra.mrb[12].mxu1 %vm713_vm3, %v1170_v60  ;;  %2726 = vmatmul.mubr.msk.bf16.gmra.mrb[8].mxu0 %vm713_vm3, %v3494_v23 }
  0xac   : > { %2653 = vmatprep.mubr.msk.bf16.mxu1 %vm713_vm3, %v3433_v28  ;;  %2729 = vmatprep.mubr.msk.bf16.mxu0 %vm713_vm3, %v3529_v62 }
  0xb3   : > { %2654 = vmatmul.mubr.msk.bf16.vlgmr.msra.gmra.mrb[8].mxu1 %vm713_vm3, %v3453_v44  ;;  %2730 = vmatmul.mubr.msk.bf16.gmra.mrb[12].mxu0 %vm713_vm3, %v1812_v51  ;;  %v3676_v44 = vld [vmem:[%s3830_s6] ss:$0 sm:$0xff] }
  0xb4   : > { %2657 = vmatprep.mubr.msk.bf16.mxu1 %vm713_vm3, %v3488_v16 }
  0xbb   : > { %2658 = vmatmul.mubr.msk.bf16.gmra.mrb[12].mxu1 %vm713_vm3, %v1301_v18 }
 0x166   : > { %v2629_v2 = vpop.f32.mrb[0].mxu1 }
 0x167   : > { %v1213_v52 = vpop.f32.mrb[1].mxu1 }
 0x168   : > { %v2630_v5 = vpop.f32.mrb[2].mxu1 }
 0x169   : > { %v1216_v24 = vpop.f32.mrb[3].mxu1 }
 0x16e   : > { %v2633_v28 = vpop.f32.mrb[4].mxu1  ;;  %v2719_v30 = vpop.f32.mrb[0].mxu0 }
 0x16f   : > { %v1229_v45 = vpop.f32.mrb[5].mxu1  ;;  %v2735_v8 = vadd.f32 %v2719_v30, %v2629_v2  ;;  %v1855_v9 = vpop.f32.mrb[1].mxu0 }
 0x170   : > { %v2634_v10 = vpop.f32.mrb[6].mxu1  ;;  %v2736_v19 = vadd.f32 %v1855_v9, %v1213_v52  ;;  %v2720_v16 = vpop.f32.mrb[2].mxu0 }
 0x171   : > { %v1232_v23 = vpop.f32.mrb[7].mxu1  ;;  %v1943_v25 = vadd.f32 %v2735_v8, %v3676_v44  ;;  %v2737_v31 = vadd.f32 %v2720_v16, %v2630_v5  ;;  %v1858_v32 = vpop.f32.mrb[3].mxu0 }
 0x172   : > { %v1941_v33 = vadd.f32 %v2736_v19, %v3676_v44  ;;  %v2738_v34 = vadd.f32 %v1858_v32, %v1216_v24 }
 0x173   : > { %v2476_v35 = vpack.c.bf16 %v1943_v25, %v1943_v25  ;;  %v1944_v36 = vadd.f32 %v2737_v31, %v3676_v44  ;;  %v2078_v42 = vmul.f32 %v1943_v25, %v1943_v25  ;;  %v2042_v1 = vsel %vm2038_vm6, %v1943_v25, 0.0 }
 0x174   : > { %v2474_v37 = vpack.c.bf16 %v1941_v33, %v1941_v33  ;;  %v2076_v38 = vmul.f32 %v1941_v33, %v1941_v33  ;;  %v1942_v40 = vadd.f32 %v2738_v34, %v3676_v44  ;;  %v2039_v47 = vsel %vm2038_vm6, %v1941_v33, 0.0 }
 0x175   : > { %2024 = vst.msk [vmem:[%s3683_s12 + $0x8] sm:$0xf] %vm2021_vm5, %v2476_v35  ;;  %v2477_v46 = vpack.c.bf16 %v1944_v36, %v1944_v36  ;;  %v2079_v56 = vmul.f32 %v1944_v36, %v1944_v36  ;;  %v2095_v43 = vsel %vm2038_vm6, %v2078_v42, 0.0  ;;  %v2044_v58 = vsel %vm2038_vm6, %v1944_v36, 0.0 }
 0x176   : > { %2022 = vst.msk [vmem:[%s3683_s12] sm:$0xf] %vm2021_vm5, %v2474_v37  ;;  %v2475_v49 = vpack.c.bf16 %v1942_v40, %v1942_v40  ;;  %v2040_v50 = vsel %vm2038_vm6, %v1942_v40, 0.0  ;;  %v2077_v53 = vmul.f32 %v1942_v40, %v1942_v40  ;;  %v2723_v54 = vpop.f32.mrb[4].mxu0  ;;  %v2092_v3 = vsel %vm2038_vm6, %v2076_v38, 0.0 }
 0x177   : > { %2025 = vst.msk [vmem:[%s3683_s12 + $0xc] sm:$0xf] %vm2021_vm5, %v2477_v46  ;;  %v2041_v59 = vadd.f32 %v2040_v50, %v2039_v47  ;;  %v2739_v62 = vadd.f32 %v2723_v54, %v2633_v28  ;;  %v1871_v63 = vpop.f32.mrb[5].mxu0  ;;  %v2097_v20 = vsel %vm2038_vm6, %v2079_v56, 0.0 }
 0x178   : > { %2023 = vst.msk [vmem:[%s3683_s12 + $0x4] sm:$0xf] %vm2021_vm5, %v2475_v49  ;;  %v2093_v6 = vsel %vm2038_vm6, %v2077_v53, 0.0  ;;  %v2740_v51 = vadd.f32 %v1871_v63, %v1229_v45  ;;  %v2724_v14 = vpop.f32.mrb[6].mxu0 }
 0x179   : > { %v2043_v15 = vadd.f32 %v2042_v1, %v2041_v59  ;;  %v2094_v17 = vadd.f32 %v2093_v6, %v2092_v3  ;;  %v1947_v21 = vadd.f32 %v2739_v62, %v3676_v44  ;;  %v2741_v4 = vadd.f32 %v2724_v14, %v2634_v10  ;;  %v1874_v11 = vpop.f32.mrb[7].mxu0 }
 0x17a   : > { %v1945_v48 = vadd.f32 %v2740_v51, %v3676_v44  ;;  %v2742_v55 = vadd.f32 %v1874_v11, %v1232_v23 }
 0x17b   : > { %v2096_v22 = vadd.f32 %v2095_v43, %v2094_v17  ;;  %v2480_v29 = vpack.c.bf16 %v1947_v21, %v1947_v21  ;;  %v2045_v57 = vadd.f32 %v2044_v58, %v2043_v15  ;;  %v1948_v12 = vadd.f32 %v2741_v4, %v3676_v44 }
 0x17c   : > { %v2478_v39 = vpack.c.bf16 %v1945_v48, %v1945_v48  ;;  %v2046_v60 = vsel %vm2038_vm6, %v1945_v48, 0.0  ;;  %v2080_v61 = vmul.f32 %v1945_v48, %v1945_v48  ;;  %v1946_v41 = vadd.f32 %v2742_v55, %v3676_v44 }
 0x17d   : > { %2028 = vst.msk [vmem:[%s3683_s12 + $0x18] sm:$0xf] %vm2021_vm5, %v2480_v29  ;;  %v2098_v7 = vadd.f32 %v2097_v20, %v2096_v22  ;;  %v2047_v27 = vadd.f32 %v2046_v60, %v2045_v57  ;;  %v2481_v18 = vpack.c.bf16 %v1948_v12, %v1948_v12  ;;  %v2082_v52 = vmul.f32 %v1947_v21, %v1947_v21 }
 0x17e   : > { %2026 = vst.msk [vmem:[%s3683_s12 + $0x10] sm:$0xf] %vm2021_vm5, %v2478_v39  ;;  %v2099_v0 = vsel %vm2038_vm6, %v2080_v61, 0.0  ;;  %v2727_v13 = vpop.f32.mrb[8].mxu0  ;;  %v2479_v5 = vpack.c.bf16 %v1946_v41, %v1946_v41  ;;  %v2048_v24 = vsel %vm2038_vm6, %v1946_v41, 0.0  ;;  %v2081_v28 = vmul.f32 %v1946_v41, %v1946_v41 }
 0x17f   : > { %v2100_v26 = vadd.f32 %v2099_v0, %v2098_v7  ;;  %v1887_v2 = vpop.f32.mrb[9].mxu0  ;;  %2029 = vst.msk [vmem:[%s3683_s12 + $0x1c] sm:$0xf] %vm2021_vm5, %v2481_v18  ;;  %v2049_v45 = vadd.f32 %v2048_v24, %v2047_v27  ;;  %v2050_v9 = vsel %vm2038_vm6, %v1947_v21, 0.0  ;;  %v2083_v10 = vmul.f32 %v1948_v12, %v1948_v12 }
 0x180   : > { %v2728_v30 = vpop.f32.mrb[10].mxu0  ;;  %2027 = vst.msk [vmem:[%s3683_s12 + $0x14] sm:$0xf] %vm2021_vm5, %v2479_v5  ;;  %v2101_v19 = vsel %vm2038_vm6, %v2081_v28, 0.0  ;;  %v2103_v25 = vsel %vm2038_vm6, %v2082_v52, 0.0  ;;  %v2052_v31 = vsel %vm2038_vm6, %v1948_v12, 0.0 }
 0x181   : > { %v1890_v8 = vpop.f32.mrb[11].mxu0  ;;  %v2051_v16 = vadd.f32 %v2050_v9, %v2049_v45  ;;  %v2102_v23 = vadd.f32 %v2101_v19, %v2100_v26  ;;  %v2105_v34 = vsel %vm2038_vm6, %v2083_v10, 0.0 }
 0x183   : > { %v2104_v32 = vadd.f32 %v2103_v25, %v2102_v23  ;;  %v2053_v33 = vadd.f32 %v2052_v31, %v2051_v16 }
 0x185   : > { %v2106_v40 = vadd.f32 %v2105_v34, %v2104_v32 }
 0x186   : > { %v2655_v35 = vpop.f32.mrb[8].mxu1  ;;  %v2731_v36 = vpop.f32.mrb[12].mxu0 }
 0x187   : > { %v2743_v37 = vadd.f32 %v2727_v13, %v2655_v35  ;;  %v1376_v38 = vpop.f32.mrb[9].mxu1  ;;  %v1903_v42 = vpop.f32.mrb[13].mxu0 }
 0x188   : > { %v2744_v46 = vadd.f32 %v1887_v2, %v1376_v38  ;;  %v2656_v47 = vpop.f32.mrb[10].mxu1  ;;  %v2732_v49 = vpop.f32.mrb[14].mxu0 }
 0x189   : > { %v1951_v50 = vadd.f32 %v2743_v37, %v3676_v44  ;;  %v2745_v53 = vadd.f32 %v2728_v30, %v2656_v47  ;;  %v1379_v54 = vpop.f32.mrb[11].mxu1  ;;  %v1906_v56 = vpop.f32.mrb[15].mxu0 }
 0x18a   : > { %v1949_v59 = vadd.f32 %v2744_v46, %v3676_v44  ;;  %v2746_v62 = vadd.f32 %v1890_v8, %v1379_v54 }
 0x18b   : > { %v2484_v63 = vpack.c.bf16 %v1951_v50, %v1951_v50  ;;  %v1952_v1 = vadd.f32 %v2745_v53, %v3676_v44  ;;  %v2086_v21 = vmul.f32 %v1951_v50, %v1951_v50  ;;  %v2058_v39 = vsel %vm2038_vm6, %v1951_v50, 0.0 }
 0x18c   : > { %v2482_v3 = vpack.c.bf16 %v1949_v59, %v1949_v59  ;;  %v2054_v6 = vsel %vm2038_vm6, %v1949_v59, 0.0  ;;  %v2084_v51 = vmul.f32 %v1949_v59, %v1949_v59  ;;  %v1950_v14 = vadd.f32 %v2746_v62, %v3676_v44 }
 0x18d   : > { %2032 = vst.msk [vmem:[%s3683_s12 + $0x28] sm:$0xf] %vm2021_vm5, %v2484_v63  ;;  %v2055_v15 = vadd.f32 %v2054_v6, %v2053_v33  ;;  %v2485_v17 = vpack.c.bf16 %v1952_v1, %v1952_v1  ;;  %v2087_v57 = vmul.f32 %v1952_v1, %v1952_v1  ;;  %v2060_v13 = vsel %vm2038_vm6, %v1952_v1, 0.0 }
 0x18e   : > { %2030 = vst.msk [vmem:[%s3683_s12 + $0x20] sm:$0xf] %vm2021_vm5, %v2482_v3  ;;  %v2107_v4 = vsel %vm2038_vm6, %v2084_v51, 0.0  ;;  %v2483_v11 = vpack.c.bf16 %v1950_v14, %v1950_v14  ;;  %v2056_v43 = vsel %vm2038_vm6, %v1950_v14, 0.0  ;;  %v2659_v48 = vpop.f32.mrb[12].mxu1  ;;  %v2085_v20 = vmul.f32 %v1950_v14, %v1950_v14 }
 0x18f   : > { %v2108_v55 = vadd.f32 %v2107_v4, %v2106_v40  ;;  %2033 = vst.msk [vmem:[%s3683_s12 + $0x2c] sm:$0xf] %vm2021_vm5, %v2485_v17  ;;  %v2057_v58 = vadd.f32 %v2056_v43, %v2055_v15  ;;  %v2747_v22 = vadd.f32 %v2731_v36, %v2659_v48  ;;  %v1392_v29 = vpop.f32.mrb[13].mxu1  ;;  %v2111_v52 = vsel %vm2038_vm6, %v2086_v21, 0.0 }
 0x190   : > { %2031 = vst.msk [vmem:[%s3683_s12 + $0x24] sm:$0xf] %vm2021_vm5, %v2483_v11  ;;  %v2748_v60 = vadd.f32 %v1903_v42, %v1392_v29  ;;  %v2660_v61 = vpop.f32.mrb[14].mxu1  ;;  %v2109_v12 = vsel %vm2038_vm6, %v2085_v20, 0.0  ;;  %v2113_v9 = vsel %vm2038_vm6, %v2087_v57, 0.0 }
 0x191   : > { %v2059_v7 = vadd.f32 %v2058_v39, %v2057_v58  ;;  %v1955_v41 = vadd.f32 %v2747_v22, %v3676_v44  ;;  %v2749_v27 = vadd.f32 %v2732_v49, %v2660_v61  ;;  %v1395_v0 = vpop.f32.mrb[15].mxu1  ;;  %v2110_v26 = vadd.f32 %v2109_v12, %v2108_v55 }
 0x192   : > { %v1953_v18 = vadd.f32 %v2748_v60, %v3676_v44  ;;  %v2750_v2 = vadd.f32 %v1906_v56, %v1395_v0 }
 0x193   : > { %v2488_v5 = vpack.c.bf16 %v1955_v41, %v1955_v41  ;;  %v2061_v24 = vadd.f32 %v2060_v13, %v2059_v7  ;;  %v2112_v28 = vadd.f32 %v2111_v52, %v2110_v26  ;;  %v1956_v19 = vadd.f32 %v2749_v27, %v3676_v44 }
 0x194   : > { %v2486_v30 = vpack.c.bf16 %v1953_v18, %v1953_v18  ;;  %v2062_v45 = vsel %vm2038_vm6, %v1953_v18, 0.0  ;;  %v2088_v8 = vmul.f32 %v1953_v18, %v1953_v18  ;;  %v1954_v16 = vadd.f32 %v2750_v2, %v3676_v44 }
 0x195   : > { %2036 = vst.msk [vmem:[%s3683_s12 + $0x38] sm:$0xf] %vm2021_vm5, %v2488_v5  ;;  %v2063_v10 = vadd.f32 %v2062_v45, %v2061_v24  ;;  %v2114_v23 = vadd.f32 %v2113_v9, %v2112_v28  ;;  %v2489_v31 = vpack.c.bf16 %v1956_v19, %v1956_v19  ;;  %v2090_v33 = vmul.f32 %v1955_v41, %v1955_v41 }
 0x196   : > { %2034 = vst.msk [vmem:[%s3683_s12 + $0x30] sm:$0xf] %vm2021_vm5, %v2486_v30  ;;  %v2115_v25 = vsel %vm2038_vm6, %v2088_v8, 0.0  ;;  %v2487_v32 = vpack.c.bf16 %v1954_v16, %v1954_v16  ;;  %v2064_v35 = vsel %vm2038_vm6, %v1954_v16, 0.0  ;;  %v2089_v36 = vmul.f32 %v1954_v16, %v1954_v16 }
 0x197   : > { %v2116_v34 = vadd.f32 %v2115_v25, %v2114_v23  ;;  %2037 = vst.msk [vmem:[%s3683_s12 + $0x3c] sm:$0xf] %vm2021_vm5, %v2489_v31  ;;  %v2065_v37 = vadd.f32 %v2064_v35, %v2063_v10  ;;  %v2066_v44 = vsel %vm2038_vm6, %v1955_v41, 0.0  ;;  %v2091_v38 = vmul.f32 %v1956_v19, %v1956_v19 }
 0x198   : > { %2035 = vst.msk [vmem:[%s3683_s12 + $0x34] sm:$0xf] %vm2021_vm5, %v2487_v32  ;;  %v2117_v40 = vsel %vm2038_vm6, %v2089_v36, 0.0  ;;  %v2119_v47 = vsel %vm2038_vm6, %v2090_v33, 0.0  ;;  %v2068_v49 = vsel %vm2038_vm6, %v1956_v19, 0.0  ;;  %s3052_s12 = smov [#allocation2]  }
 0x199   : > { %v2067_v42 = vadd.f32 %v2066_v44, %v2065_v37  ;;  %v2118_v46 = vadd.f32 %v2117_v40, %v2116_v34  ;;  %v2121_v54 = vsel %vm2038_vm6, %v2091_v38, 0.0  ;;  %s2960_s20 = sshll.u32 %s3052_s12, 4  ;;  %s2961_s20 = int_to_ptr.vmem [resolvable:$false] %s2960_s20 }
 0x19a   : > { %s2962_s18 = scalar_lea.vmem %s2961_s20, 64  ;;  %p2963_p10 = scmp.lt.s32.totalorder %s3772_s11, %s2961_s20 }
 0x19b   : > { %v2069_v50 = vadd.f32 %v2068_v49, %v2067_v42  ;;  %v2120_v53 = vadd.f32 %v2119_v47, %v2118_v46  ;;  %p2964_p11 = scmp.lt.s32.totalorder %s2962_s18, %s2956_s29 }
 0x19d   : > { %v2070_v56 = vrot.slane %v2069_v50, 4  ;;  %v2122_v59 = vadd.f32 %v2121_v54, %v2120_v53  ;;  %p2965_p12 = por %p2964_p11, %p2963_p10 }
 0x19f   : > { %v2071_v62 = vadd.f32 %v2070_v56, %v2069_v50  ;;  %v2123_v63 = vrot.slane %v2122_v59, 4  ;;  %p2966_p13 = pnand %p2965_p12, %p2959_p9 }
 0x1a1   : > { %v2072_v1 = vrot.slane %v2071_v62, 2  ;;  %v2124_v3 = vadd.f32 %v2123_v63, %v2122_v59 }
 0x1a3   : > { %v2073_v6 = vadd.f32 %v2072_v1, %v2071_v62  ;;  %v2125_v51 = vrot.slane %v2124_v3, 2 }
 0x1a5   : > { %v2074_v14 = vrot.slane %v2073_v6, 1  ;;  %v2126_v15 = vadd.f32 %v2125_v51, %v2124_v3 }
 0x1a7   : > { %v2127_v17 = vrot.slane %v2126_v15, 1  ;;  %v2075_v21 = vadd.f32 %v2074_v14, %v2073_v6 }
 0x1a9   : > { %v2128_v4 = vadd.f32 %v2127_v17, %v2126_v15 }
 0x1ab   : > { %v2129_v11 = vsel %vm540_vm1, %v2075_v21, %v2128_v4 }
 0x1ac   : > { %2131 = vst.msk [vmem:[%s430_s24] sm:$0x3] %vm2130_vm7, %v2129_v11 }
 0x1ad   : > { %2969 = shalt.err (!%p2966_p13)
}
 0x1ae   : > { %s2970_s25 = scalar_lea.hbm %s3770_s26, 32  ;;  %s2974_s24 = scalar_lea.hbm %s3832_s8, 128 }
 0x1af   : > { %p2971_p0 = scmp.ne.s32.totalorder %s3770_s26, %s2970_s25  ;;  %p2975_p4 = scmp.lt.u32.totalorder %s3770_s26, %s3832_s8 }
 0x1b0   : > { %p2976_p5 = scmp.lt.u32.totalorder %s2974_s24, %s2970_s25  ;;  %p2978_p7 = scmp.lt.u32.totalorder %s2970_s25, %s3770_s26 }
 0x1b1   : > { %p2972_p1 = pnand %p2971_p0, %p3149_p3 }
 0x1b2   : > { %p2977_p6 = por %p2976_p5, %p2975_p4 }
 0x1b3   : > { %p2973_p2 = pneg %p2972_p1 }
 0x1b4   : > { %p2979_p9 = por %p2978_p7, %p2977_p6 }
 0x1b6   : > { %p2980_p10 = pnand %p2979_p9, %p2973_p2 }
 0x1b8   : > { %2983 = shalt.err (!%p2980_p10)
}
 0x1b9   : > { %2873 = dma.vmem_to_hbm [thread:$0]  (%p3149_p3), %s3772_s11, 32, %s3770_s26, %s2143_s4  }
 0x1ba PF: > { %p2879_p11 = scmp.ge.s32.totalorder %s3050_s10, 2  ;;  %s2187_s29 = sand.u32 1, %s3022_s27  }
 0x1bb   : > { %s2188_s12 = scalar_lea.sflag [#allocation3], %s2187_s29 }
 0x1bc   : > { %p2876_p12 = pnand %p2879_p11, %p3158_p8 }
 0x1be   : > { %3017 = dma.done.wait (!%p2876_p12), %s2188_s12, 32  }
 0x1bf   : > { %3019 = vsyncadd (!%p2876_p12), %s2188_s12, 4294967264  ;;  %s22_s10 = sadd.s32 1, %s3050_s10   ;;  %s3836_s27 = smov %s3026_s3 }
 0x1c0   : > { %p19_p13 = scmp.ge.s32.totalorder %s22_s10, 6   ;;  %s3837_s3 = smov %s3030_s28 }
 0x1c1   : > { %s3838_s28 = smov %s3167_s21  ;;  %s3839_s4 = smov %s3042_s30 }
 0x1c2   : > { %s3840_s29 = smov %s3046_s9  ;;  %s3841_s30 = smov %s3844_s13 }
 0x1c3   : > { %s3842_s9 = smov %s3848_s14  ;;  %21 = sbr.rel (!%p19_p13) target bundleno = 5 (0x5), region = 109 }
 0x1ca   :  { %2193 = vsyncpa [#allocation3], 1 }
 0x1cb   :  { %2195 = vsyncpa [#allocation3 + $0x1], 1 }

</bundles_post_ra>
